<compile_context>
chip_gen: v5e
topology: v5e:2x2
jax: 0.10.0
libtpu: 0.0.40
codegen_flags: <defaults>
</compile_context>

<pallas_src>
import jax
import jax.numpy as jnp
from jax.experimental import pallas as pl
from jax.experimental.pallas import tpu as pltpu


# ----------------------------------------------------------------------------
# Pallas kernel: fused MLP forward (3 MXU layers + 1-row MXU value head).
# ----------------------------------------------------------------------------
def _value_mlp_kernel(x_ref,
                      w1_ref, b1_ref,
                      w2_ref, b2_ref,
                      w3_ref, b3_ref,
                      w4_ref, b4_ref,
                      o_ref):
    cdt = w1_ref.dtype                      # MXU compute dtype (bf16)

    # In-kernel f32 -> bf16 cast: x makes a single HBM pass in f32, MXU sees
    # bf16.  (Upstream producers emitting bf16 directly would halve this too.)
    x = x_ref[...].astype(cdt)

    # Layer 1: [TM, 256] @ [256, 256] -> f32 acc; bias + ReLU in f32.
    h = jnp.dot(x, w1_ref[...], preferred_element_type=jnp.float32)
    h = jnp.maximum(h + b1_ref[...], 0.0)

    # Layer 2: [TM, 256] @ [256, 128]
    h = jnp.dot(h.astype(cdt), w2_ref[...], preferred_element_type=jnp.float32)
    h = jnp.maximum(h + b2_ref[...], 0.0)

    # Layer 3: [TM, 128] @ [128, 128]   (width zero-padded 64 -> 128)
    h = jnp.dot(h.astype(cdt), w3_ref[...], preferred_element_type=jnp.float32)
    h = jnp.maximum(h + b3_ref[...], 0.0)            # (TM, 128) f32

    # Value head: (1, 128) contracted against (TM, 128) on their last axes
    # -> (1, TM).  Lane-dense row output; negligible MXU work vs. layers 1-3.
    v = jax.lax.dot_general(
        w4_ref[...], h,
        dimension_numbers=(((1,), (1,)), ((), ())),
        preferred_element_type=jnp.float32)
    o_ref[...] = (v + b4_ref[...]).astype(o_ref.dtype)


# ----------------------------------------------------------------------------
# One-time parameter preparation (cast / pad outside the per-call path).
# ----------------------------------------------------------------------------
def prepare_params(params, compute_dtype=jnp.bfloat16):
    """params: list of (W [in,out], b [1,out]) f32.  Returns kernel operands."""
    (w1, b1), (w2, b2), (w3, b3), (w4, b4) = params
    h3 = w3.shape[1]
    h3p = max(128, ((h3 + 127) // 128) * 128)         # pad head width to >=128
    pad = h3p - h3

    w1c = w1.astype(compute_dtype)
    w2c = w2.astype(compute_dtype)
    w3c = jnp.pad(w3, ((0, 0), (0, pad))).astype(compute_dtype)

    b1f = b1.astype(jnp.float32).reshape(1, -1)
    b2f = b2.astype(jnp.float32).reshape(1, -1)
    b3f = jnp.pad(b3.astype(jnp.float32).reshape(1, -1), ((0, 0), (0, pad)))

    w4_row = jnp.pad(w4.astype(jnp.float32).reshape(1, -1), ((0, 0), (0, pad)))
    b4f = b4.astype(jnp.float32).reshape(1, 1)
    return (w1c, b1f, w2c, b2f, w3c, b3f, w4_row, b4f)


def _pick_tm(batch, tm_max):
    """Batch tile: multiple of 256, no larger than the (rounded-up) batch."""
    tm_max = max(256, (tm_max // 256) * 256)
    b_round = ((batch + 255) // 256) * 256
    return min(tm_max, b_round)


# ----------------------------------------------------------------------------
# Forward wrapper.
# ----------------------------------------------------------------------------
def value_network_forward(x, prepared, *, tm_max=1024):
    """x: [B, embedding_dim] float32.  Returns [B, 1] float32."""
    (w1c, b1f, w2c, b2f, w3c, b3f, w4_row, b4f) = prepared
    B, D = x.shape
    h1 = w1c.shape[1]
    h2 = w2c.shape[1]
    h3p = w3c.shape[1]

    tm = _pick_tm(B, tm_max)
    Bp = ((B + tm - 1) // tm) * tm
    if Bp != B:
        x = jnp.pad(x, ((0, Bp - B), (0, 0)))
    grid = Bp // tm

    # Advisory cost estimate (x read in f32, bf16 weights, f32 row output).
    flops = 2 * Bp * (D * h1 + h1 * h2 + h2 * h3p + h3p * 1)
    bytes_accessed = (Bp * D * 4                                   # x (f32)
                      + (D * h1 + h1 * h2 + h2 * h3p) * 2          # bf16 weights
                      + (h1 + h2 + h3p + h3p + 1) * 4              # biases + w4
                      + Bp * 4)                                    # output
    cost = pl.CostEstimate(flops=int(flops), transcendentals=0,
                           bytes_accessed=int(bytes_accessed))

    # Weight / bias specs: full array, same block for every grid step
    # (Pallas does not re-DMA an unchanged block across steps).
    def full(a):
        return pl.BlockSpec(a.shape, lambda i: (0, 0))

    cp_kwargs = dict(dimension_semantics=("parallel",))
    if tm >= 4096:
        # v5e default scoped VMEM is 16 MiB; very large tiles need headroom.
        cp_kwargs["vmem_limit_bytes"] = 48 * 1024 * 1024

    out = pl.pallas_call(
        _value_mlp_kernel,
        out_shape=jax.ShapeDtypeStruct((1, Bp), jnp.float32),
        grid_spec=pltpu.PrefetchScalarGridSpec(
            num_scalar_prefetch=0,
            grid=(grid,),
            in_specs=[
                pl.BlockSpec((tm, D), lambda i: (i, 0)),   # x tile (f32)
                full(w1c), full(b1f),
                full(w2c), full(b2f),
                full(w3c), full(b3f),
                full(w4_row), full(b4f),
            ],
            # Lane-dense output: each grid step writes a [1, tm] row slab.
            out_specs=pl.BlockSpec((1, tm), lambda i: (0, i)),
        ),
        compiler_params=pltpu.CompilerParams(**cp_kwargs),
        cost_estimate=cost,
    )(x, w1c, b1f, w2c, b2f, w3c, b3f, w4_row, b4f)

    # (1, Bp) row-major == (Bp, 1) row-major: reshape is free; slice padding.
    return out.reshape(Bp, 1)[:B]


def value_network_get_value(x, prepared, **kw):
    """PyTorch get_value(): forward with gradients detached."""
    return jax.lax.stop_gradient(value_network_forward(x, prepared, **kw))


# ----------------------------------------------------------------------------
# Deterministic parameter construction (orthogonal init gain=sqrt(2), zero bias)
# ----------------------------------------------------------------------------
def init_params(key, embedding_dim=256, hidden_dims=(256, 128, 64)):
    dims = [embedding_dim] + list(hidden_dims) + [1]
    ortho = jax.nn.initializers.orthogonal(scale=float(jnp.sqrt(2.0)))
    params = []
    for d_in, d_out in zip(dims[:-1], dims[1:]):
        key, sub = jax.random.split(key)
        # PyTorch Linear weight is [out, in]; orthogonal_ is applied to that
        # shape.  We store the transpose [in, out] for x @ W.
        w_pt = ortho(sub, (d_out, d_in), jnp.float32)       # [out, in]
        w = jnp.transpose(w_pt)                             # [in, out]
        b = jnp.zeros((1, d_out), jnp.float32)
        params.append((w, b))
    return params


def _reference_forward(x, params):
    h = x
    for i, (w, b) in enumerate(params):
        h = h @ w + b
        if i < len(params) - 1:
            h = jnp.maximum(h, 0.0)
    return h


if __name__ == "__main__":
    key = jax.random.PRNGKey(0)
    pkey, xkey = jax.random.split(key)

    embedding_dim = 256
    batch = 8  # small smoke-test batch; wrapper pads to one 256-row tile.

    params = init_params(pkey, embedding_dim=embedding_dim,
                         hidden_dims=(256, 128, 64))
    prepared = prepare_params(params)           # one-time bf16 cast / padding
    x = jax.random.normal(xkey, (batch, embedding_dim), dtype=jnp.float32)

    out = value_network_forward(x, prepared)
    out = jax.block_until_ready(out)

    ref = _reference_forward(x, params)          # f32 reference
    assert out.shape == (batch, 1)
    # bf16 MXU path: loosened tolerance vs. the f32 reference.
    assert jnp.allclose(out, ref, atol=1e-1, rtol=1e-2), "mismatch vs reference"

    print("KERNEL_OK")
</pallas_src>

<mosaic_0001>
module attributes {stable_mosaic.version = 11 : i64} {
  func.func @_value_mlp_kernel(%arg0: i32, %arg1: memref<256x256xf32, #tpu.memory_space<vmem>>, %arg2: memref<256x256xbf16, #tpu.memory_space<vmem>>, %arg3: memref<1x256xf32, #tpu.memory_space<vmem>>, %arg4: memref<256x128xbf16, #tpu.memory_space<vmem>>, %arg5: memref<1x128xf32, #tpu.memory_space<vmem>>, %arg6: memref<128x128xbf16, #tpu.memory_space<vmem>>, %arg7: memref<1x128xf32, #tpu.memory_space<vmem>>, %arg8: memref<1x128xf32, #tpu.memory_space<vmem>>, %arg9: memref<1x1xf32, #tpu.memory_space<vmem>>, %arg10: memref<1x256xf32, #tpu.memory_space<vmem>>) attributes {dimension_semantics = [#tpu.dimension_semantics<parallel>], iteration_bounds = array<i64: 1>, scalar_prefetch = 0 : i64, scratch_operands = 0 : i64, tpu.core_type = #tpu.core_type<tc>, window_params = [{transform_indices = @transform_0, window_bounds = array<i64: 256, 256>}, {pipeline_mode = #tpu.pipeline_mode<synchronous>, transform_indices = @transform_1, window_bounds = array<i64: 256, 256>}, {pipeline_mode = #tpu.pipeline_mode<synchronous>, transform_indices = @transform_2, window_bounds = array<i64: 1, 256>}, {pipeline_mode = #tpu.pipeline_mode<synchronous>, transform_indices = @transform_3, window_bounds = array<i64: 256, 128>}, {pipeline_mode = #tpu.pipeline_mode<synchronous>, transform_indices = @transform_4, window_bounds = array<i64: 1, 128>}, {pipeline_mode = #tpu.pipeline_mode<synchronous>, transform_indices = @transform_5, window_bounds = array<i64: 128, 128>}, {pipeline_mode = #tpu.pipeline_mode<synchronous>, transform_indices = @transform_6, window_bounds = array<i64: 1, 128>}, {pipeline_mode = #tpu.pipeline_mode<synchronous>, transform_indices = @transform_7, window_bounds = array<i64: 1, 128>}, {pipeline_mode = #tpu.pipeline_mode<synchronous>, transform_indices = @transform_8, window_bounds = array<i64: 1, 1>}, {transform_indices = @transform_9, window_bounds = array<i64: 1, 256>}]} {
    %c0 = arith.constant 0 : index
    %c0_0 = arith.constant 0 : index
    %0 = vector.load %arg1[%c0, %c0_0] : memref<256x256xf32, #tpu.memory_space<vmem>>, vector<256x256xf32>
    %1 = arith.truncf %0 : vector<256x256xf32> to vector<256x256xbf16>
    %c0_1 = arith.constant 0 : index
    %c0_2 = arith.constant 0 : index
    %2 = vector.load %arg2[%c0_1, %c0_2] : memref<256x256xbf16, #tpu.memory_space<vmem>>, vector<256x256xbf16>
    %cst = arith.constant dense<0.000000e+00> : vector<256x256xf32>
    %3 = tpu.matmul %1, %2, %cst {dimension_numbers = #tpu.dot_dimension_numbers<[1], [0], [0], [1], [0, 0, 1, 1], [], []>} : vector<256x256xbf16>, vector<256x256xbf16>, vector<256x256xf32> -> vector<256x256xf32>
    %c0_3 = arith.constant 0 : index
    %c0_4 = arith.constant 0 : index
    %4 = vector.load %arg3[%c0_3, %c0_4] : memref<1x256xf32, #tpu.memory_space<vmem>>, vector<1x256xf32>
    %5 = vector.broadcast %4 : vector<1x256xf32> to vector<256x256xf32>
    %6 = arith.addf %3, %5 : vector<256x256xf32>
    %cst_5 = arith.constant 0.000000e+00 : f32
    %7 = vector.broadcast %cst_5 : f32 to vector<256x256xf32>
    %8 = arith.maximumf %6, %7 : vector<256x256xf32>
    %9 = arith.truncf %8 : vector<256x256xf32> to vector<256x256xbf16>
    %c0_6 = arith.constant 0 : index
    %c0_7 = arith.constant 0 : index
    %10 = vector.load %arg4[%c0_6, %c0_7] : memref<256x128xbf16, #tpu.memory_space<vmem>>, vector<256x128xbf16>
    %cst_8 = arith.constant dense<0.000000e+00> : vector<256x128xf32>
    %11 = tpu.matmul %9, %10, %cst_8 {dimension_numbers = #tpu.dot_dimension_numbers<[1], [0], [0], [1], [0, 0, 1, 1], [], []>} : vector<256x256xbf16>, vector<256x128xbf16>, vector<256x128xf32> -> vector<256x128xf32>
    %c0_9 = arith.constant 0 : index
    %c0_10 = arith.constant 0 : index
    %12 = vector.load %arg5[%c0_9, %c0_10] : memref<1x128xf32, #tpu.memory_space<vmem>>, vector<1x128xf32>
    %13 = vector.broadcast %12 : vector<1x128xf32> to vector<256x128xf32>
    %14 = arith.addf %11, %13 : vector<256x128xf32>
    %cst_11 = arith.constant 0.000000e+00 : f32
    %15 = vector.broadcast %cst_11 : f32 to vector<256x128xf32>
    %16 = arith.maximumf %14, %15 : vector<256x128xf32>
    %17 = arith.truncf %16 : vector<256x128xf32> to vector<256x128xbf16>
    %c0_12 = arith.constant 0 : index
    %c0_13 = arith.constant 0 : index
    %18 = vector.load %arg6[%c0_12, %c0_13] : memref<128x128xbf16, #tpu.memory_space<vmem>>, vector<128x128xbf16>
    %cst_14 = arith.constant dense<0.000000e+00> : vector<256x128xf32>
    %19 = tpu.matmul %17, %18, %cst_14 {dimension_numbers = #tpu.dot_dimension_numbers<[1], [0], [0], [1], [0, 0, 1, 1], [], []>} : vector<256x128xbf16>, vector<128x128xbf16>, vector<256x128xf32> -> vector<256x128xf32>
    %c0_15 = arith.constant 0 : index
    %c0_16 = arith.constant 0 : index
    %20 = vector.load %arg7[%c0_15, %c0_16] : memref<1x128xf32, #tpu.memory_space<vmem>>, vector<1x128xf32>
    %21 = vector.broadcast %20 : vector<1x128xf32> to vector<256x128xf32>
    %22 = arith.addf %19, %21 : vector<256x128xf32>
    %cst_17 = arith.constant 0.000000e+00 : f32
    %23 = vector.broadcast %cst_17 : f32 to vector<256x128xf32>
    %24 = arith.maximumf %22, %23 : vector<256x128xf32>
    %c0_18 = arith.constant 0 : index
    %c0_19 = arith.constant 0 : index
    %25 = vector.load %arg8[%c0_18, %c0_19] : memref<1x128xf32, #tpu.memory_space<vmem>>, vector<1x128xf32>
    %cst_20 = arith.constant dense<0.000000e+00> : vector<1x256xf32>
    %26 = tpu.matmul %25, %24, %cst_20 {dimension_numbers = #tpu.dot_dimension_numbers<[1], [1], [0], [0], [0, 0, 1, 0], [], []>} : vector<1x128xf32>, vector<256x128xf32>, vector<1x256xf32> -> vector<1x256xf32>
    %c0_21 = arith.constant 0 : index
    %c0_22 = arith.constant 0 : index
    %27 = vector.load %arg9[%c0_21, %c0_22] : memref<1x1xf32, #tpu.memory_space<vmem>>, vector<1x1xf32>
    %28 = vector.broadcast %27 : vector<1x1xf32> to vector<1x256xf32>
    %29 = arith.addf %26, %28 : vector<1x256xf32>
    %c0_23 = arith.constant 0 : index
    %c0_24 = arith.constant 0 : index
    %30 = vector.load %arg10[%c0_23, %c0_24] : memref<1x256xf32, #tpu.memory_space<vmem>>, vector<1x256xf32>
    tpu.vector_store %arg10[%c0_23, %c0_24], %29 {strides = array<i32>} : memref<1x256xf32, #tpu.memory_space<vmem>>, vector<1x256xf32>,
    return
  }
  func.func @transform_0(%arg0: i32) -> (i32, i32) {
    %c0_i32 = arith.constant 0 : i32
    %c0_i32_0 = arith.constant 0 : i32
    return %arg0, %c0_i32 : i32, i32
  }
  func.func @transform_1(%arg0: i32) -> (i32, i32) {
    %c0_i32 = arith.constant 0 : i32
    %c0_i32_0 = arith.constant 0 : i32
    %c0_i32_1 = arith.constant 0 : i32
    return %c0_i32, %c0_i32_0 : i32, i32
  }
  func.func @transform_2(%arg0: i32) -> (i32, i32) {
    %c0_i32 = arith.constant 0 : i32
    %c0_i32_0 = arith.constant 0 : i32
    %c0_i32_1 = arith.constant 0 : i32
    return %c0_i32, %c0_i32_0 : i32, i32
  }
  func.func @transform_3(%arg0: i32) -> (i32, i32) {
    %c0_i32 = arith.constant 0 : i32
    %c0_i32_0 = arith.constant 0 : i32
    %c0_i32_1 = arith.constant 0 : i32
    return %c0_i32, %c0_i32_0 : i32, i32
  }
  func.func @transform_4(%arg0: i32) -> (i32, i32) {
    %c0_i32 = arith.constant 0 : i32
    %c0_i32_0 = arith.constant 0 : i32
    %c0_i32_1 = arith.constant 0 : i32
    return %c0_i32, %c0_i32_0 : i32, i32
  }
  func.func @transform_5(%arg0: i32) -> (i32, i32) {
    %c0_i32 = arith.constant 0 : i32
    %c0_i32_0 = arith.constant 0 : i32
    %c0_i32_1 = arith.constant 0 : i32
    return %c0_i32, %c0_i32_0 : i32, i32
  }
  func.func @transform_6(%arg0: i32) -> (i32, i32) {
    %c0_i32 = arith.constant 0 : i32
    %c0_i32_0 = arith.constant 0 : i32
    %c0_i32_1 = arith.constant 0 : i32
    return %c0_i32, %c0_i32_0 : i32, i32
  }
  func.func @transform_7(%arg0: i32) -> (i32, i32) {
    %c0_i32 = arith.constant 0 : i32
    %c0_i32_0 = arith.constant 0 : i32
    %c0_i32_1 = arith.constant 0 : i32
    return %c0_i32, %c0_i32_0 : i32, i32
  }
  func.func @transform_8(%arg0: i32) -> (i32, i32) {
    %c0_i32 = arith.constant 0 : i32
    %c0_i32_0 = arith.constant 0 : i32
    %c0_i32_1 = arith.constant 0 : i32
    return %c0_i32, %c0_i32_0 : i32, i32
  }
  func.func @transform_9(%arg0: i32) -> (i32, i32) {
    %c0_i32 = arith.constant 0 : i32
    %c0_i32_0 = arith.constant 0 : i32
    return %c0_i32, %arg0 : i32, i32
  }
}

</mosaic_0001>

<bundles_post_ra>
// kernel: tpu_custom_call.1
= control target key start
LH: loop header
LB: loop body
LE: loop exit
PB: predicated region body
PF: predicated region fallthrough
CT: control target
= control target key end

     0   :  { %s2405_s0 = inlined_call_operand.hbm [shape: f32[256,256], index: 0, kind: input, shape index: {}]   ;;  %s2406_s1 = inlined_call_operand.hbm [shape: bf16[256,256], index: 1, kind: input, shape index: {}]   ;;  %s2407_s2 = inlined_call_operand.vmem [shape: f32[1,256], index: 2, kind: input, shape index: {}]   ;;  %s2408_s3 = inlined_call_operand.hbm [shape: bf16[256,128], index: 3, kind: input, shape index: {}]   ;;  %s2409_s4 = inlined_call_operand.vmem [shape: f32[1,128], index: 4, kind: input, shape index: {}]   ;;  %s2410_s5 = inlined_call_operand.hbm [shape: bf16[128,128], index: 5, kind: input, shape index: {}]   ;;  %s2411_s6 = inlined_call_operand.vmem [shape: f32[1,128], index: 6, kind: input, shape index: {}]   ;;  %s2412_s7 = inlined_call_operand.vmem [shape: f32[1,128], index: 7, kind: input, shape index: {}]   ;;  %s2413_s8 = inlined_call_operand.<no memory space> [shape: f32[1,1], index: 8, kind: input, shape index: {}]   ;;  %s2414_s9 = inlined_call_operand.hbm [shape: f32[1,256], index: 9, kind: output, shape index: {}]  }
   0x1   :  { %v14_v0 = vstv %s2413_s8 }
   0x2   :  { %15 = vst [vmem:[#allocation2] sm:$0x1] %v14_v0 }
   0x3   :  { %16 = vsyncpa [#allocation4], 0 }
   0x4   :  { %17 = vsyncpa [#allocation7], 0 }
   0x5   :  { %18 = vsyncpa [#allocation10], 0  ;;  %s37_s13 = sshll.u32 %s2406_s1, 4  ;;  %s38_s13 = int_to_ptr.hbm [resolvable:$true] %s37_s13 }
   0x6   :  { %19 = vsyncpa [#allocation5], 0  ;;  %s1916_s14 = smov [#allocation6]   ;;  %s24_s18 = sshll.u32 %s2405_s0, 4  ;;  %s25_s18 = int_to_ptr.hbm [resolvable:$true] %s24_s18 }
   0x7   :  { %s39_s15 = sshll.u32 %s1916_s14, 4  ;;  %s1917_s19 = smov 128   ;;  %s40_s15 = int_to_ptr.vmem [resolvable:$true] %s39_s15 }
   0x8   :  { %s1918_s20 = smov 8   ;;  %s1919_s8 = smov [#allocation3]  }
   0x9   :  { %45 = dma.hbm_to_vmem [thread:$0]  %s38_s13, 4096, %s40_s15, [#allocation7], %s1917_s19, %s1917_s19, %s1918_s20  }
   0xa   :  { %s26_s21 = sshll.u32 %s1919_s8, 4  ;;  %s1920_s22 = smov 256   ;;  %s27_s21 = int_to_ptr.vmem [resolvable:$true] %s26_s21 }
   0xb   :  { %s1921_s23 = smov 16   ;;  %s52_s25 = sshll.u32 %s2408_s3, 4  ;;  %s53_s25 = int_to_ptr.hbm [resolvable:$true] %s52_s25 }
   0xc   :  { %32 = dma.hbm_to_vmem [thread:$0]  %s25_s18, 8192, %s27_s21, [#allocation4], %s1920_s22, %s1920_s22, %s1921_s23  }
   0xd   :  { %s1922_s26 = smov [#allocation8]   ;;  %s67_s29 = sshll.u32 %s2410_s5, 4  ;;  %s68_s29 = int_to_ptr.hbm [resolvable:$true] %s67_s29 }
   0xe   :  { %s54_s27 = sshll.u32 %s1922_s26, 4  ;;  %s1923_s30 = smov 64   ;;  %s55_s27 = int_to_ptr.vmem [resolvable:$true] %s54_s27 }
   0xf   :  { %s1924_s10 = smov 4   ;;  %s1925_s11 = smov [#allocation9]  }
  0x10   :  { %60 = dma.hbm_to_vmem [thread:$0]  %s53_s25, 2048, %s55_s27, [#allocation7], %s1923_s30, %s1923_s30, %s1924_s10  }
  0x11   :  { %s69_s12 = sshll.u32 %s1925_s11, 4  ;;  %s70_s12 = int_to_ptr.vmem [resolvable:$true] %s69_s12 }
  0x12   :  { %75 = dma.hbm_to_vmem [thread:$0]  %s68_s29, 1024, %s70_s12, [#allocation10], %s1923_s30, %s1923_s30, %s1924_s10  }
  0x13   :  { %1908 = dma.done.wait [#allocation4], 8192  }
  0x14   :  { %1909 = vsyncadd [#allocation4], 4294959104 }
  0x15   :  { %1910 = dma.done.wait [#allocation7], 6144  }
  0x16   :  { %1911 = vsyncadd [#allocation7], 4294961152 }
  0x17   :  { %1912 = dma.done.wait [#allocation10], 1024  }
  0x18   :  { %1913 = vsyncadd [#allocation10], 4294966272  ;;  %v1527_v1 = vld [vmem:[#allocation6 + $0x70] sm:$0xf]  ;;  %v1708_v2 = vld [vmem:[#allocation6 + $0x74] sm:$0xf0] }
  0x19   :  { %v1519_v3 = vld [vmem:[#allocation6 + $0x60] sm:$0xf]  ;;  %v1528_v4 = vor.u32 %v1708_v2, %v1527_v1  ;;  %v1706_v5 = vld [vmem:[#allocation6 + $0x64] sm:$0xf0]  ;;  %v1591_v6 = vld [vmem:[#allocation6 + $0xf0] sm:$0xf] }
  0x1a   :  { %v1724_v7 = vld [vmem:[#allocation6 + $0xf4] sm:$0xf0]  ;;  %v1520_v8 = vor.u32 %v1706_v5, %v1519_v3  ;;  %v1583_v10 = vld [vmem:[#allocation6 + $0xe0] sm:$0xf]  ;;  %v1722_v11 = vld [vmem:[#allocation6 + $0xe4] sm:$0xf0] }
  0x1b   :  { %392 = vmatpush.bf16.msra.mxu0 %v1528_v4  ;;  %1749 = vmatpush.bf16.msra.mxu3 %v1528_v4  ;;  %v1993_v9 = vor.u32 %v1724_v7, %v1591_v6  ;;  %v1511_v12 = vld [vmem:[#allocation6 + $0x50] sm:$0xf]  ;;  %v1704_v13 = vld [vmem:[#allocation6 + $0x54] sm:$0xf0]  ;;  %v1996_v14 = vor.u32 %v1722_v11, %v1583_v10  ;;  %v1503_v18 = vld [vmem:[#allocation6 + $0x40] sm:$0xf] }
  0x1c   :  { %v1575_v15 = vld [vmem:[#allocation6 + $0xd0] sm:$0xf]  ;;  %v1720_v16 = vld [vmem:[#allocation6 + $0xd4] sm:$0xf0]  ;;  %v1512_v17 = vor.u32 %v1704_v13, %v1511_v12  ;;  %v1702_v19 = vld [vmem:[#allocation6 + $0x44] sm:$0xf0] }
  0x1d   :  { %481 = vmatpush.bf16.msra.mxu1 %v1993_v9  ;;  %v1999_v20 = vor.u32 %v1720_v16, %v1575_v15  ;;  %v1567_v21 = vld [vmem:[#allocation6 + $0xc0] sm:$0xf]  ;;  %v1718_v22 = vld [vmem:[#allocation6 + $0xc4] sm:$0xf0]  ;;  %v1504_v23 = vor.u32 %v1702_v19, %v1503_v18  ;;  %v1495_v24 = vld [vmem:[#allocation6 + $0x30] sm:$0xf] }
  0x1e   :  { %v1700_v25 = vld [vmem:[#allocation6 + $0x34] sm:$0xf0]  ;;  %v2002_v26 = vor.u32 %v1718_v22, %v1567_v21  ;;  %v1559_v27 = vld [vmem:[#allocation6 + $0xb0] sm:$0xf]  ;;  %v1487_v30 = vld [vmem:[#allocation6 + $0x20] sm:$0xf] }
  0x1f   :  { %393 = vmatpush.bf16.msra.mxu0 %v1520_v8  ;;  %1750 = vmatpush.bf16.msra.mxu3 %v1520_v8  ;;  %v1716_v28 = vld [vmem:[#allocation6 + $0xb4] sm:$0xf0]  ;;  %v1496_v29 = vor.u32 %v1700_v25, %v1495_v24  ;;  %v1698_v31 = vld [vmem:[#allocation6 + $0x24] sm:$0xf0]  ;;  %v1551_v33 = vld [vmem:[#allocation6 + $0xa0] sm:$0xf] }
  0x20   :  { %v2005_v32 = vor.u32 %v1716_v28, %v1559_v27  ;;  %v1714_v34 = vld [vmem:[#allocation6 + $0xa4] sm:$0xf0]  ;;  %v1488_v35 = vor.u32 %v1698_v31, %v1487_v30  ;;  %v1479_v36 = vld [vmem:[#allocation6 + $0x10] sm:$0xf]  ;;  %v1696_v37 = vld [vmem:[#allocation6 + $0x14] sm:$0xf0] }
  0x21   :  { %482 = vmatpush.bf16.msra.mxu1 %v1996_v14  ;;  %v2008_v38 = vor.u32 %v1714_v34, %v1551_v33  ;;  %v1543_v39 = vld [vmem:[#allocation6 + $0x90] sm:$0xf]  ;;  %v1712_v40 = vld [vmem:[#allocation6 + $0x94] sm:$0xf0]  ;;  %v1480_v41 = vor.u32 %v1696_v37, %v1479_v36  ;;  %v1471_v42 = vld [vmem:[#allocation6] sm:$0xf] }
  0x22   :  { %v1694_v43 = vld [vmem:[#allocation6 + $0x4] sm:$0xf0]  ;;  %v2011_v44 = vor.u32 %v1712_v40, %v1543_v39  ;;  %v98_v45 = vld [vmem:[#allocation3] sm:$0xff]  ;;  %v100_v49 = vld [vmem:[#allocation3 + $0x10] sm:$0xff]  ;;  %s1457_s19 = sshll.u32 %s2414_s9, 4  ;;  %vm1442_vm0 = vcmask 1040384   ;;  %s1458_s19 = int_to_ptr.hbm [resolvable:$true] %s1457_s19 }
  0x23   :  { %394 = vmatpush.bf16.msra.mxu0 %v1512_v17  ;;  %1751 = vmatpush.bf16.msra.mxu3 %v1512_v17  ;;  %v1535_v46 = vld [vmem:[#allocation6 + $0x80] sm:$0xf]  ;;  %v1710_v47 = vld [vmem:[#allocation6 + $0x84] sm:$0xf0]  ;;  %v1472_v48 = vor.u32 %v1694_v43, %v1471_v42  ;;  %v156_v51 = vld [vmem:[#allocation3 + $0x1d0] sm:$0xff]  ;;  %v2016_v55 = vpack.c.bf16 %v100_v49, %v98_v45 }
  0x24   :  { %v154_v50 = vld [vmem:[#allocation3 + $0x1c0] sm:$0xff]  ;;  %v2014_v52 = vor.u32 %v1710_v47, %v1535_v46  ;;  %v99_v53 = vld [vmem:[#allocation3 + $0x8] sm:$0xff]  ;;  %v101_v54 = vld [vmem:[#allocation3 + $0x18] sm:$0xff] }
  0x25   :  { %483 = vmatpush.bf16.msra.mxu1 %v1999_v20  ;;  %v2018_v56 = vpack.c.bf16 %v156_v51, %v154_v50  ;;  %v2021_v57 = vpack.c.bf16 %v101_v54, %v99_v53  ;;  %v1707_v58 = vld [vmem:[#allocation6 + $0x74] sm:$0xf]  ;;  %v1529_v59 = vld [vmem:[#allocation6 + $0x78] sm:$0xf0]  ;;  %v1705_v61 = vld [vmem:[#allocation6 + $0x64] sm:$0xf] }
  0x26   :  { %v1532_v60 = vor.u32 %v1707_v58, %v1529_v59  ;;  %v1521_v62 = vld [vmem:[#allocation6 + $0x68] sm:$0xf0]  ;;  %v1703_v0 = vld [vmem:[#allocation6 + $0x54] sm:$0xf]  ;;  %v1513_v1 = vld [vmem:[#allocation6 + $0x58] sm:$0xf0] }
  0x27   :  { %395 = vmatpush.bf16.msra.mxu0 %v1504_v23  ;;  %1752 = vmatpush.bf16.msra.mxu3 %v1504_v23  ;;  %v1524_v63 = vor.u32 %v1705_v61, %v1521_v62  ;;  %v1516_v2 = vor.u32 %v1703_v0, %v1513_v1  ;;  %v102_v3 = vld [vmem:[#allocation3 + $0x20] sm:$0xff]  ;;  %v1505_v5 = vld [vmem:[#allocation6 + $0x48] sm:$0xf0]  ;;  %v104_v6 = vld [vmem:[#allocation3 + $0x30] sm:$0xff] }
  0x28   :  { %570 = vmatpush.bf16.msra.mxu2 %v1532_v60  ;;  %v1701_v4 = vld [vmem:[#allocation6 + $0x44] sm:$0xf]  ;;  %v160_v8 = vld [vmem:[#allocation3 + $0x1f0] sm:$0xff]  ;;  %v105_v10 = vld [vmem:[#allocation3 + $0x38] sm:$0xff]  ;;  %v164_v12 = vpack.c.bf16 %v104_v6, %v102_v3 }
  0x29   :  { %484 = vmatpush.bf16.msra.mxu1 %v2002_v26  ;;  %v158_v7 = vld [vmem:[#allocation3 + $0x1e0] sm:$0xff]  ;;  %v1508_v11 = vor.u32 %v1701_v4, %v1505_v5  ;;  %v1699_v15 = vld [vmem:[#allocation6 + $0x34] sm:$0xf]  ;;  %v1497_v16 = vld [vmem:[#allocation6 + $0x38] sm:$0xf0] }
  0x2a   :  { %v2030_v13 = vpack.c.bf16 %v160_v8, %v158_v7  ;;  %v1500_v17 = vor.u32 %v1699_v15, %v1497_v16  ;;  %v1697_v18 = vld [vmem:[#allocation6 + $0x24] sm:$0xf]  ;;  %v1489_v19 = vld [vmem:[#allocation6 + $0x28] sm:$0xf0]  ;;  %v1695_v21 = vld [vmem:[#allocation6 + $0x14] sm:$0xf] }
  0x2b   :  { %396 = vmatpush.bf16.msra.mxu0 %v1496_v29  ;;  %1753 = vmatpush.bf16.msra.mxu3 %v1496_v29  ;;  %v1481_v22 = vld [vmem:[#allocation6 + $0x18] sm:$0xf0]  ;;  %v106_v24 = vld [vmem:[#allocation3 + $0x40] sm:$0xff]  ;;  %v108_v27 = vld [vmem:[#allocation3 + $0x50] sm:$0xff] }
  0x2c   :  { %571 = vmatpush.bf16.msra.mxu2 %v1524_v63  ;;  %v1484_v23 = vor.u32 %v1695_v21, %v1481_v22  ;;  %v1693_v25 = vld [vmem:[#allocation6 + $0x4] sm:$0xf]  ;;  %v155_v28 = vld [vmem:[#allocation3 + $0x1c8] sm:$0xff]  ;;  %v157_v29 = vld [vmem:[#allocation3 + $0x1d8] sm:$0xff]  ;;  %v166_v33 = vpack.c.bf16 %v108_v27, %v106_v24 }
  0x2d   :  { %485 = vmatpush.bf16.msra.mxu1 %v2005_v32  ;;  %v107_v30 = vld [vmem:[#allocation3 + $0x48] sm:$0xff]  ;;  %v109_v31 = vld [vmem:[#allocation3 + $0x58] sm:$0xff]  ;;  %v2040_v34 = vpack.c.bf16 %v157_v29, %v155_v28  ;;  %v110_v36 = vld [vmem:[#allocation3 + $0x60] sm:$0xff] }
  0x2e   :  { %v112_v37 = vld [vmem:[#allocation3 + $0x70] sm:$0xff]  ;;  %v161_v39 = vld [vmem:[#allocation3 + $0x1f8] sm:$0xff]  ;;  %v111_v40 = vld [vmem:[#allocation3 + $0x68] sm:$0xff] }
  0x2f   :  { %397 = vmatpush.bf16.msra.mxu0 %v1488_v35  ;;  %1754 = vmatpush.bf16.msra.mxu3 %v1488_v35  ;;  %v2042_v35 = vpack.c.bf16 %v109_v31, %v107_v30  ;;  %v2047_v42 = vpack.c.bf16 %v112_v37, %v110_v36  ;;  %v1723_v45 = vld [vmem:[#allocation6 + $0xf4] sm:$0xf]  ;;  %v1593_v46 = vld [vmem:[#allocation6 + $0xf8] sm:$0xf0]  ;;  %v1721_v50 = vld [vmem:[#allocation6 + $0xe4] sm:$0xf] }
  0x30   :  { %572 = vmatpush.bf16.msra.mxu2 %v1516_v2  ;;  %v1732_v47 = vld [vmem:[#allocation8 + $0x38] sm:$0xff]  ;;  %v1596_v49 = vor.u32 %v1723_v45, %v1593_v46  ;;  %v1585_v51 = vld [vmem:[#allocation6 + $0xe8] sm:$0xf0]  ;;  %v114_v53 = vld [vmem:[#allocation3 + $0x80] sm:$0xff] }
  0x31   :  { %486 = vmatpush.bf16.msra.mxu1 %v2008_v38  ;;  %v116_v54 = vld [vmem:[#allocation3 + $0x90] sm:$0xff]  ;;  %v1577_v58 = vld [vmem:[#allocation6 + $0xd8] sm:$0xf0]  ;;  %v115_v59 = vld [vmem:[#allocation3 + $0x88] sm:$0xff] }
  0x32   :  { %v170_v61 = vpack.c.bf16 %v116_v54, %v114_v53  ;;  %v1717_v0 = vld [vmem:[#allocation6 + $0xc4] sm:$0xf]  ;;  %v1569_v1 = vld [vmem:[#allocation6 + $0xc8] sm:$0xf0]  ;;  %v1715_v3 = vld [vmem:[#allocation6 + $0xb4] sm:$0xf] }
  0x33   :  { %398 = vmatpush.bf16.msra.mxu0 %v1480_v41  ;;  %1755 = vmatpush.bf16.msra.mxu3 %v1480_v41  ;;  %v113_v41 = vld [vmem:[#allocation3 + $0x78] sm:$0xff]  ;;  %v1713_v6 = vld [vmem:[#allocation6 + $0xa4] sm:$0xf]  ;;  %v1553_v7 = vld [vmem:[#allocation6 + $0xa8] sm:$0xf0] }
  0x34   :  { %573 = vmatpush.bf16.msra.mxu2 %v1508_v11  ;;  %v1561_v4 = vld [vmem:[#allocation6 + $0xb8] sm:$0xf0]  ;;  %v118_v8 = vld [vmem:[#allocation3 + $0xa0] sm:$0xff]  ;;  %v119_v15 = vld [vmem:[#allocation3 + $0xa8] sm:$0xff] }
  0x35   :  { %487 = vmatpush.bf16.msra.mxu1 %v2011_v44  ;;  %v1564_v5 = vor.u32 %v1715_v3, %v1561_v4  ;;  %v121_v16 = vld [vmem:[#allocation3 + $0xb8] sm:$0xff]  ;;  %v1731_v21 = vld [vmem:[#allocation8 + $0x30] sm:$0xff]  ;;  %v122_v24 = vld [vmem:[#allocation3 + $0xc0] sm:$0xff] }
  0x36   :  { %v1739_v22 = vld [vmem:[#allocation8 + $0x70] sm:$0xff]  ;;  %v125_v27 = vld [vmem:[#allocation3 + $0xd8] sm:$0xff]  ;;  %v127_v31 = vld [vmem:[#allocation3 + $0xe8] sm:$0xff] }
  0x37   :  { %399 = vmatpush.bf16.msra.mxu0 %v1472_v48  ;;  %1756 = vmatpush.bf16.msra.mxu3 %v1472_v48  ;;  %v1740_v48 = vld [vmem:[#allocation8 + $0x78] sm:$0xff]  ;;  %v128_v30 = vld [vmem:[#allocation3 + $0xf0] sm:$0xff]  ;;  %v1730_v37 = vld [vmem:[#allocation8 + $0x28] sm:$0xff] }
  0x38   :  { %574 = vmatpush.bf16.msra.mxu2 %v1500_v17 }
  0x39   :  { %488 = vmatpush.bf16.msra.mxu1 %v2014_v52 }
  0x3a   :  { %400 = vmatmul.bf16.vlgmr.msra.gmra.mxu0 %v2016_v55  ;;  %470 = vmatmul.bf16.vlgmr.msra.gmra.mxu3 %v2018_v56 }
  0x3b   :  { %1757 = vmatpush.bf16.msrb.mxu3 %v1993_v9  ;;  %v103_v9 = vld [vmem:[#allocation3 + $0x28] sm:$0xff]  ;;  %976 = vmatpush.bf16.msrb.mxu0 %v1732_v47 }
  0x3c   :  { %489 = vmatmul.bf16.vlgmr.msra.gmra.mxu1 %v2021_v57 }
  0x3d   :  { %1065 = vmatpush.bf16.msrb.mxu1 %v1740_v48 }
  0x3f   :  { %1758 = vmatpush.bf16.msrb.mxu3 %v1996_v14  ;;  %v2033_v14 = vpack.c.bf16 %v105_v10, %v103_v9  ;;  %v120_v9 = vld [vmem:[#allocation3 + $0xb0] sm:$0xff]  ;;  %v1556_v10 = vor.u32 %v1713_v6, %v1553_v7  ;;  %977 = vmatpush.bf16.msrb.mxu0 %v1731_v21  ;;  %v1729_v6 = vld [vmem:[#allocation8 + $0x20] sm:$0xff] }
  0x40   :  { %v1737_v7 = vld [vmem:[#allocation8 + $0x60] sm:$0xff] }
  0x41   :  { %1066 = vmatpush.bf16.msrb.mxu1 %v1739_v22  ;;  %v139_v22 = vld [vmem:[#allocation3 + $0x148] sm:$0xff] }
  0x43   :  { %1759 = vmatpush.bf16.msrb.mxu3 %v1999_v20  ;;  %v1492_v20 = vor.u32 %v1697_v18, %v1489_v19  ;;  %v2060_v18 = vpack.c.bf16 %v121_v16, %v119_v15  ;;  %v1709_v19 = vld [vmem:[#allocation6 + $0x84] sm:$0xf]  ;;  %978 = vmatpush.bf16.msrb.mxu0 %v1730_v37 }
  0x45   :  { %575 = vmatpush.bf16.msra.mxu2 %v1492_v20 }
  0x47   :  { %1760 = vmatpush.bf16.msrb.mxu3 %v2002_v26  ;;  %v1473_v26 = vld [vmem:[#allocation6 + $0x8] sm:$0xf0]  ;;  %979 = vmatpush.bf16.msrb.mxu0 %v1729_v6  ;;  %v1727_v6 = vld [vmem:[#allocation8 + $0x10] sm:$0xff] }
  0x49   :  { %576 = vmatpush.bf16.msra.mxu2 %v1484_v23 }
  0x4a   :  { %405 = vmatmul.bf16.gmra.mxu0 %v164_v12  ;;  %475 = vmatmul.bf16.gmra.mxu3 %v2030_v13 }
  0x4b   :  { %1761 = vmatpush.bf16.msrb.mxu3 %v2005_v32  ;;  %v1476_v32 = vor.u32 %v1693_v25, %v1473_v26  ;;  %v124_v25 = vld [vmem:[#allocation3 + $0xd0] sm:$0xff]  ;;  %v123_v26 = vld [vmem:[#allocation3 + $0xc8] sm:$0xff] }
  0x4c   :  { %494 = vmatmul.bf16.gmra.mxu1 %v2033_v14  ;;  %v174_v28 = vpack.c.bf16 %v124_v25, %v122_v24  ;;  %v2065_v29 = vpack.c.bf16 %v125_v27, %v123_v26 }
  0x4d   :  { %577 = vmatpush.bf16.msra.mxu2 %v1476_v32 }
  0x4f   :  { %1762 = vmatpush.bf16.msrb.mxu3 %v2008_v38  ;;  %v159_v38 = vld [vmem:[#allocation3 + $0x1e8] sm:$0xff] }
  0x50   :  { %578 = vmatmul.bf16.vlgmr.msra.gmra.mxu2 %v2016_v55  ;;  %v2049_v43 = vpack.c.bf16 %v161_v39, %v159_v38  ;;  %v1719_v55 = vld [vmem:[#allocation6 + $0xd4] sm:$0xf]  ;;  %v1738_v38 = vld [vmem:[#allocation8 + $0x68] sm:$0xff]  ;;  %v130_v39 = vld [vmem:[#allocation3 + $0x100] sm:$0xff] }
  0x51   :  { %v1580_v62 = vor.u32 %v1719_v55, %v1577_v58  ;;  %1067 = vmatpush.bf16.msrb.mxu1 %v1738_v38  ;;  %v1728_v38 = vld [vmem:[#allocation8 + $0x18] sm:$0xff] }
  0x52   :  { %980 = vmatpush.bf16.msrb.mxu0 %v1728_v38 }
  0x53   :  { %1763 = vmatpush.bf16.msrb.mxu3 %v2011_v44  ;;  %v2051_v44 = vpack.c.bf16 %v113_v41, %v111_v40  ;;  %v132_v40 = vld [vmem:[#allocation3 + $0x110] sm:$0xff]  ;;  %v131_v41 = vld [vmem:[#allocation3 + $0x108] sm:$0xff] }
  0x55   :  { %1068 = vmatpush.bf16.msrb.mxu1 %v1737_v7 }
  0x56   :  { %981 = vmatpush.bf16.msrb.mxu0 %v1727_v6 }
  0x57   :  { %1764 = vmatpush.bf16.msrb.mxu3 %v2014_v52  ;;  %v1588_v52 = vor.u32 %v1721_v50, %v1585_v51 }
  0x5a   :  { %410 = vmatmul.bf16.gmra.mxu0 %v166_v33  ;;  %559 = vmatmul.bf16.vlgmr.msrb.gmra.mxu3 %v2040_v34 }
  0x5b   :  { %1765 = vmatpush.bf16.msra.mxu3 %v1532_v60  ;;  %v117_v60 = vld [vmem:[#allocation3 + $0x98] sm:$0xff] }
  0x5c   :  { %499 = vmatmul.bf16.gmra.mxu1 %v2042_v35 }
  0x5f   :  { %1766 = vmatpush.bf16.msra.mxu3 %v1524_v63  ;;  %v2056_v63 = vpack.c.bf16 %v117_v60, %v115_v59  ;;  %v134_v59 = vld [vmem:[#allocation3 + $0x120] sm:$0xff]  ;;  %v136_v60 = vld [vmem:[#allocation3 + $0x130] sm:$0xff] }
  0x60   :  { %583 = vmatmul.bf16.gmra.mxu2 %v164_v12  ;;  %v1545_v12 = vld [vmem:[#allocation6 + $0x98] sm:$0xf0] }
  0x63   :  { %1767 = vmatpush.bf16.msra.mxu3 %v1516_v2  ;;  %v1572_v2 = vor.u32 %v1717_v0, %v1569_v1  ;;  %v135_v0 = vld [vmem:[#allocation3 + $0x128] sm:$0xff]  ;;  %v137_v1 = vld [vmem:[#allocation3 + $0x138] sm:$0xff] }
  0x67   :  { %1768 = vmatpush.bf16.msra.mxu3 %v1508_v11  ;;  %v1711_v11 = vld [vmem:[#allocation6 + $0x94] sm:$0xf] }
  0x6a   :  { %415 = vmatmul.bf16.gmra.mxu0 %v2047_v42  ;;  %564 = vmatmul.bf16.gmra.mxu3 %v2049_v43 }
  0x6b   :  { %1769 = vmatpush.bf16.msra.mxu3 %v1500_v17  ;;  %v1548_v17 = vor.u32 %v1711_v11, %v1545_v12 }
  0x6c   :  { %504 = vmatmul.bf16.gmra.mxu1 %v2051_v44 }
  0x6f   :  { %1770 = vmatpush.bf16.msra.mxu3 %v1492_v20  ;;  %v1537_v20 = vld [vmem:[#allocation6 + $0x88] sm:$0xf0] }
  0x70   :  { %588 = vmatmul.bf16.gmra.mxu2 %v166_v33 }
  0x73   :  { %1771 = vmatpush.bf16.msra.mxu3 %v1484_v23  ;;  %v1540_v23 = vor.u32 %v1709_v19, %v1537_v20  ;;  %v140_v19 = vld [vmem:[#allocation3 + $0x150] sm:$0xff] }
  0x77   :  { %1772 = vmatpush.bf16.msra.mxu3 %v1476_v32  ;;  %v129_v32 = vld [vmem:[#allocation3 + $0xf8] sm:$0xff] }
  0x78   :  { %v2069_v36 = vpack.c.bf16 %v129_v32, %v127_v31 }
  0x7a   :  { %420 = vmatmul.bf16.gmra.mxu0 %v170_v61  ;;  %648 = vmatmul.bf16.vlgmr.msra.gmra.mxu3 %v2018_v56  ;;  %v172_v56 = vpack.c.bf16 %v120_v9, %v118_v8 }
  0x7b   :  { %659 = vmatpush.bf16.msrb.mxu3 %v1596_v49 }
  0x7c   :  { %509 = vmatmul.bf16.gmra.mxu1 %v2056_v63 }
  0x7f   :  { %660 = vmatpush.bf16.msrb.mxu3 %v1588_v52 }
  0x80   :  { %593 = vmatmul.bf16.gmra.mxu2 %v2047_v42  ;;  %v133_v42 = vld [vmem:[#allocation3 + $0x118] sm:$0xff] }
  0x81   :  { %v2082_v48 = vpack.c.bf16 %v133_v42, %v131_v41  ;;  %v142_v42 = vld [vmem:[#allocation3 + $0x160] sm:$0xff] }
  0x83   :  { %661 = vmatpush.bf16.msrb.mxu3 %v1580_v62 }
  0x87   :  { %662 = vmatpush.bf16.msrb.mxu3 %v1572_v2 }
  0x8a   :  { %425 = vmatmul.bf16.gmra.mxu0 %v172_v56  ;;  %653 = vmatmul.bf16.gmra.mxu3 %v2030_v13  ;;  %v126_v13 = vld [vmem:[#allocation3 + $0xe0] sm:$0xff] }
  0x8b   :  { %663 = vmatpush.bf16.msrb.mxu3 %v1564_v5  ;;  %v176_v33 = vpack.c.bf16 %v128_v30, %v126_v13  ;;  %v2092_v5 = vpack.c.bf16 %v137_v1, %v135_v0 }
  0x8c   :  { %514 = vmatmul.bf16.gmra.mxu1 %v2060_v18 }
  0x8f   :  { %664 = vmatpush.bf16.msrb.mxu3 %v1556_v10 }
  0x90   :  { %598 = vmatmul.bf16.gmra.mxu2 %v170_v61 }
  0x93   :  { %665 = vmatpush.bf16.msrb.mxu3 %v1548_v17  ;;  %v138_v17 = vld [vmem:[#allocation3 + $0x140] sm:$0xff] }
  0x97   :  { %666 = vmatpush.bf16.msrb.mxu3 %v1540_v23  ;;  %v2100_v23 = vpack.c.bf16 %v140_v19, %v138_v17  ;;  %v148_v17 = vld [vmem:[#allocation3 + $0x190] sm:$0xff] }
  0x9a   :  { %430 = vmatmul.bf16.gmra.mxu0 %v174_v28  ;;  %667 = vmatmul.bf16.vlgmr.msrb.gmra.mxu3 %v2021_v57  ;;  %v2076_v57 = vld [vmem:[%s2407_s2] sm:$0x3] }
  0x9b   :  { %v2079_v45 = vperm.slane %v2076_v57, 0 }
  0x9c   :  { %519 = vmatmul.bf16.gmra.mxu1 %v2065_v29 }
  0xa0   :  { %603 = vmatmul.bf16.gmra.mxu2 %v172_v56 }
  0xaa   :  { %435 = vmatmul.bf16.gmra.mxu0 %v176_v33  ;;  %672 = vmatmul.bf16.gmra.mxu3 %v2033_v14  ;;  %v178_v14 = vpack.c.bf16 %v132_v40, %v130_v39 }
  0xac   :  { %524 = vmatmul.bf16.gmra.mxu1 %v2069_v36 }
  0xb0   :  { %608 = vmatmul.bf16.gmra.mxu2 %v174_v28 }
  0xb7   :  { %v401_v46 = vpop.f32.mrf.mxu0 }
  0xb8   :  { %v402_v47 = vadd.f32 %v401_v46, %v2079_v45  ;;  %v144_v46 = vld [vmem:[#allocation3 + $0x170] sm:$0xff] }
  0xb9   :  { %v490_v49 = vpop.f32.mrf.mxu1 }
  0xba   :  { %440 = vmatmul.bf16.gmra.mxu0 %v178_v14  ;;  %677 = vmatmul.bf16.gmra.mxu3 %v2042_v35  ;;  %v491_v50 = vadd.f32 %v490_v49, %v402_v47  ;;  %v2089_v35 = vpack.c.bf16 %v136_v60, %v134_v59 }
  0xbc   :  { %529 = vmatmul.bf16.gmra.mxu1 %v2082_v48  ;;  %v748_v55 = vmax.f32 %v491_v50, 0.0  ;;  %v143_v50 = vld [vmem:[#allocation3 + $0x168] sm:$0xff] }
  0xbd   :  { %v471_v51 = vpop.f32.mrf.mxu3 }
  0xbe   :  { %v472_v30 = vadd.f32 %v471_v51, %v2079_v45  ;;  %v145_v51 = vld [vmem:[#allocation3 + $0x178] sm:$0xff] }
  0xbf   :  { %v403_v52 = vpop.f32.mrf.mxu0 }
  0xc0   :  { %v404_v53 = vadd.f32 %v403_v52, %v2079_v45  ;;  %613 = vmatmul.bf16.gmra.mxu2 %v176_v33 }
  0xc1   :  { %v492_v54 = vpop.f32.mrf.mxu1 }
  0xc2   :  { %v493_v58 = vadd.f32 %v492_v54, %v404_v53  ;;  %v1736_v53 = vld [vmem:[#allocation8 + $0x58] sm:$0xff] }
  0xc3   :  { %1069 = vmatpush.bf16.msrb.mxu1 %v1736_v53  ;;  %v1734_v53 = vld [vmem:[#allocation8 + $0x48] sm:$0xff] }
  0xc4   :  { %v750_v61 = vmax.f32 %v493_v58, 0.0 }
  0xc5   :  { %v473_v62 = vpop.f32.mrf.mxu3 }
  0xc6   :  { %v2087_v2 = vpack.c.bf16 %v750_v61, %v748_v55  ;;  %v2118_v61 = vpack.c.bf16 %v145_v51, %v143_v50  ;;  %v150_v51 = vld [vmem:[#allocation3 + $0x1a0] sm:$0xff] }
  0xc7   :  { %v406_v3 = vpop.f32.mrf.mxu0 }
  0xc8   :  { %v407_v4 = vadd.f32 %v406_v3, %v2079_v45 }
  0xc9   :  { %v495_v8 = vpop.f32.mrf.mxu1 }
  0xca   :  { %445 = vmatmul.bf16.gmra.mxu0 %v2089_v35  ;;  %682 = vmatmul.bf16.gmra.mxu3 %v2051_v44  ;;  %v496_v9 = vadd.f32 %v495_v8, %v407_v4  ;;  %v141_v44 = vld [vmem:[#allocation3 + $0x158] sm:$0xff] }
  0xcb   :  { %v2105_v27 = vpack.c.bf16 %v141_v44, %v139_v22  ;;  %v149_v22 = vld [vmem:[#allocation3 + $0x198] sm:$0xff]  ;;  %v1725_v44 = vld [vmem:[#allocation8] sm:$0xff] }
  0xcc   :  { %534 = vmatmul.bf16.gmra.mxu1 %v2092_v5  ;;  %v752_v16 = vmax.f32 %v496_v9, 0.0 }
  0xcd   :  { %v476_v10 = vpop.f32.mrf.mxu3 }
  0xce   :  { %v477_v3 = vadd.f32 %v476_v10, %v2079_v45 }
  0xcf   :  { %v408_v11 = vpop.f32.mrf.mxu0 }
  0xd0   :  { %v409_v12 = vadd.f32 %v408_v11, %v2079_v45  ;;  %618 = vmatmul.bf16.gmra.mxu2 %v178_v14  ;;  %v2113_v14 = vpack.c.bf16 %v144_v46, %v142_v42  ;;  %v1735_v42 = vld [vmem:[#allocation8 + $0x50] sm:$0xff] }
  0xd1   :  { %v497_v15 = vpop.f32.mrf.mxu1  ;;  %1070 = vmatpush.bf16.msrb.mxu1 %v1735_v42 }
  0xd2   :  { %v498_v56 = vadd.f32 %v497_v15, %v409_v12  ;;  %v1726_v12 = vld [vmem:[#allocation8 + $0x8] sm:$0xff] }
  0xd3   :  { %v2128_v11 = vpop.f32.mrf.mxu2  ;;  %982 = vmatpush.bf16.msrb.mxu0 %v1726_v12 }
  0xd4   :  { %v754_v20 = vmax.f32 %v498_v56, 0.0  ;;  %v146_v56 = vld [vmem:[#allocation3 + $0x180] sm:$0xff] }
  0xd5   :  { %v2098_v21 = vpop.f32.mrf.mxu3  ;;  %1071 = vmatpush.bf16.msrb.mxu1 %v1734_v53 }
  0xd6   :  { %v2102_v24 = vpack.c.bf16 %v754_v20, %v752_v16  ;;  %v479_v10 = vadd.f32 %v2098_v21, %v2079_v45  ;;  %v147_v20 = vld [vmem:[#allocation3 + $0x188] sm:$0xff] }
  0xd7   :  { %v411_v25 = vpop.f32.mrf.mxu0  ;;  %983 = vmatpush.bf16.msrb.mxu0 %v1725_v44 }
  0xd8   :  { %v412_v26 = vadd.f32 %v411_v25, %v2079_v45 }
  0xd9   :  { %v500_v28 = vpop.f32.mrf.mxu1 }
  0xda   :  { %450 = vmatmul.bf16.gmra.mxu0 %v2100_v23  ;;  %687 = vmatmul.bf16.gmra.mxu3 %v2056_v63  ;;  %v501_v13 = vadd.f32 %v500_v28, %v412_v26  ;;  %v474_v63 = vadd.f32 %v473_v62, %v2079_v45  ;;  %v2132_v26 = vpack.c.bf16 %v148_v17, %v146_v56 }
  0xdb   :  { %v2141_v38 = vpop.f32.mrf.mxu2 }
  0xdc   :  { %539 = vmatmul.bf16.gmra.mxu1 %v2105_v27  ;;  %v756_v40 = vmax.f32 %v501_v13, 0.0 }
  0xdd   :  { %v560_v31 = vpop.f32.mrf.mxu3 }
  0xde   :  { %v561_v32 = vadd.f32 %v560_v31, %v472_v30 }
  0xdf   :  { %v413_v33 = vpop.f32.mrf.mxu0 }
  0xe0   :  { %v414_v37 = vadd.f32 %v413_v33, %v2079_v45  ;;  %v804_v58 = vmax.f32 %v561_v32, 0.0  ;;  %623 = vmatmul.bf16.gmra.mxu2 %v2089_v35  ;;  %v2137_v33 = vpack.c.bf16 %v149_v22, %v147_v20 }
  0xe1   :  { %v502_v39 = vpop.f32.mrf.mxu1 }
  0xe2   :  { %v503_v41 = vadd.f32 %v502_v39, %v414_v37 }
  0xe3   :  { %v2150_v50 = vpop.f32.mrf.mxu2 }
  0xe4   :  { %v758_v47 = vmax.f32 %v503_v41, 0.0 }
  0xe5   :  { %v562_v49 = vpop.f32.mrf.mxu3 }
  0xe6   :  { %v563_v52 = vadd.f32 %v562_v49, %v474_v63  ;;  %v2115_v54 = vpack.c.bf16 %v758_v47, %v756_v40  ;;  %v1748_v63 = vld [vmem:[#allocation9 + $0x38] sm:$0xff] }
  0xe7   :  { %v416_v55 = vpop.f32.mrf.mxu0  ;;  %1270 = vmatpush.bf16.msrb.mxu2 %v1748_v63 }
  0xe8   :  { %v806_v59 = vmax.f32 %v563_v52, 0.0  ;;  %v417_v60 = vadd.f32 %v416_v55, %v2079_v45  ;;  %v152_v52 = vld [vmem:[#allocation3 + $0x1b0] sm:$0xff] }
  0xe9   :  { %v505_v0 = vpop.f32.mrf.mxu1 }
  0xea   :  { %455 = vmatmul.bf16.gmra.mxu0 %v2113_v14  ;;  %692 = vmatmul.bf16.gmra.mxu3 %v2060_v18  ;;  %v506_v62 = vadd.f32 %v505_v0, %v417_v60  ;;  %v2122_v1 = vpack.c.bf16 %v806_v59, %v804_v58  ;;  %v153_v59 = vld [vmem:[#allocation3 + $0x1b8] sm:$0xff]  ;;  %v188_v60 = vpack.c.bf16 %v152_v52, %v150_v51 }
  0xec   :  { %544 = vmatmul.bf16.gmra.mxu1 %v2118_v61  ;;  %v760_v15 = vmax.f32 %v506_v62, 0.0 }
  0xed   :  { %v565_v4 = vpop.f32.mrf.mxu3 }
  0xee   :  { %v566_v7 = vadd.f32 %v565_v4, %v477_v3  ;;  %v1733_v3 = vld [vmem:[#allocation8 + $0x40] sm:$0xff] }
  0xef   :  { %v418_v8 = vpop.f32.mrf.mxu0  ;;  %1072 = vmatpush.bf16.msrb.mxu1 %v1733_v3 }
  0xf0   :  { %v419_v9 = vadd.f32 %v418_v8, %v2079_v45  ;;  %v808_v30 = vmax.f32 %v566_v7, 0.0  ;;  %628 = vmatmul.bf16.gmra.mxu2 %v2100_v23  ;;  %v151_v23 = vld [vmem:[#allocation3 + $0x1a8] sm:$0xff] }
  0xf1   :  { %v507_v18 = vpop.f32.mrf.mxu1  ;;  %v2157_v6 = vpack.c.bf16 %v153_v59, %v151_v23 }
  0xf2   :  { %v508_v16 = vadd.f32 %v507_v18, %v419_v9  ;;  %v586_v9 = vpop.f32.mrf.mxu2 }
  0xf4   :  { %v762_v35 = vmax.f32 %v508_v16, 0.0 }
  0xf5   :  { %v567_v19 = vpop.f32.mrf.mxu3 }
  0xf6   :  { %v568_v25 = vadd.f32 %v567_v19, %v479_v10  ;;  %v2134_v28 = vpack.c.bf16 %v762_v35, %v760_v15 }
  0xf7   :  { %v421_v13 = vpop.f32.mrf.mxu0 }
  0xf8   :  { %v810_v31 = vmax.f32 %v568_v25, 0.0  ;;  %v422_v32 = vadd.f32 %v421_v13, %v2079_v45 }
  0xf9   :  { %v510_v37 = vpop.f32.mrf.mxu1 }
  0xfa   :  { %460 = vmatmul.bf16.gmra.mxu0 %v2132_v26  ;;  %697 = vmatmul.bf16.gmra.mxu3 %v2065_v29  ;;  %v511_v21 = vadd.f32 %v510_v37, %v422_v32  ;;  %v2143_v39 = vpack.c.bf16 %v810_v31, %v808_v30  ;;  %v2165_v10 = vpop.f32.mrf.mxu2  ;;  %v2178_v30 = vperm.slane %v2076_v57, 1 }
  0xfc   :  { %549 = vmatmul.bf16.gmra.mxu1 %v2137_v33  ;;  %v764_v49 = vmax.f32 %v511_v21, 0.0  ;;  %v580_v32 = vadd.f32 %v2128_v11, %v2178_v30  ;;  %v1747_v21 = vld [vmem:[#allocation9 + $0x30] sm:$0xff]  ;;  %v585_v3 = vadd.f32 %v2150_v50, %v2178_v30 }
  0xfd   :  { %v2147_v40 = vpop.f32.mrf.mxu3  ;;  %1271 = vmatpush.bf16.msrb.mxu2 %v1747_v21  ;;  %v590_v21 = vadd.f32 %v2165_v10, %v2178_v30 }
  0xff   :  { %v423_v41 = vpop.f32.mrf.mxu0 }
 0x100   :  { %v424_v46 = vadd.f32 %v423_v41, %v2079_v45  ;;  %633 = vmatmul.bf16.gmra.mxu2 %v2113_v14 }
 0x101   :  { %v512_v47 = vpop.f32.mrf.mxu1 }
 0x102   :  { %v513_v29 = vadd.f32 %v512_v47, %v424_v46  ;;  %v2174_v25 = vpop.f32.mrf.mxu2 }
 0x104   :  { %v766_v55 = vmax.f32 %v513_v29, 0.0 }
 0x105   :  { %v2152_v58 = vpop.f32.mrf.mxu3 }
 0x106   :  { %v2154_v0 = vpack.c.bf16 %v766_v55, %v764_v49 }
 0x107   :  { %v426_v62 = vpop.f32.mrf.mxu0 }
 0x108   :  { %v427_v4 = vadd.f32 %v426_v62, %v2079_v45 }
 0x109   :  { %v515_v7 = vpop.f32.mrf.mxu1 }
 0x10a   :  { %465 = vmatmul.bf16.gmra.mxu0 %v188_v60  ;;  %702 = vmatmul.bf16.gmra.mxu3 %v2069_v36  ;;  %v516_v8 = vadd.f32 %v515_v7, %v427_v4 }
 0x10c   :  { %554 = vmatmul.bf16.gmra.mxu1 %v2157_v6  ;;  %v768_v56 = vmax.f32 %v516_v8, 0.0 }
 0x10d   :  { %v2162_v12 = vpop.f32.mrf.mxu3 }
 0x10f   :  { %v428_v18 = vpop.f32.mrf.mxu0 }
 0x110   :  { %v429_v15 = vadd.f32 %v428_v18, %v2079_v45  ;;  %638 = vmatmul.bf16.gmra.mxu2 %v2132_v26  ;;  %v582_v26 = vadd.f32 %v2141_v38, %v2178_v30 }
 0x111   :  { %v517_v16 = vpop.f32.mrf.mxu1 }
 0x112   :  { %v518_v17 = vadd.f32 %v517_v16, %v429_v15 }
 0x114   :  { %v770_v35 = vmax.f32 %v518_v17, 0.0 }
 0x115   :  { %v2167_v19 = vpop.f32.mrf.mxu3 }
 0x116   :  { %v2169_v36 = vpack.c.bf16 %v770_v35, %v768_v56 }
 0x117   :  { %v431_v20 = vpop.f32.mrf.mxu0 }
 0x118   :  { %v432_v22 = vadd.f32 %v431_v20, %v2079_v45 }
 0x119   :  { %v520_v44 = vpop.f32.mrf.mxu1 }
 0x11a   :  { %707 = vmatmul.bf16.gmra.mxu3 %v2082_v48  ;;  %984 = vmatmul.bf16.vlgmr.msrb.gmra.mxu0 %v2087_v2  ;;  %v521_v14 = vadd.f32 %v520_v44, %v432_v22  ;;  %v2183_v2 = vpop.f32.mrf.mxu2  ;;  %v1746_v44 = vld [vmem:[#allocation9 + $0x28] sm:$0xff] }
 0x11b   :  { %1272 = vmatpush.bf16.msrb.mxu2 %v1746_v44 }
 0x11c   :  { %v772_v48 = vmax.f32 %v521_v14, 0.0 }
 0x11d   :  { %v668_v13 = vpop.f32.mrf.mxu3 }
 0x11e   :  { %v669_v46 = vadd.f32 %v668_v13, %v580_v32 }
 0x11f   :  { %v433_v31 = vpop.f32.mrf.mxu0 }
 0x120   :  { %v434_v37 = vadd.f32 %v433_v31, %v2079_v45  ;;  %v749_v11 = vmax.f32 %v669_v46, 0.0  ;;  %643 = vmatmul.bf16.gmra.mxu2 %v188_v60 }
 0x121   :  { %v522_v41 = vpop.f32.mrf.mxu1 }
 0x122   :  { %v523_v42 = vadd.f32 %v522_v41, %v434_v37  ;;  %v596_v59 = vpop.f32.mrf.mxu2 }
 0x124   :  { %v774_v63 = vmax.f32 %v523_v42, 0.0 }
 0x125   :  { %v670_v57 = vpop.f32.mrf.mxu3 }
 0x126   :  { %v671_v47 = vadd.f32 %v670_v57, %v582_v26  ;;  %v2187_v49 = vpack.c.bf16 %v774_v63, %v772_v48 }
 0x127   :  { %v436_v29 = vpop.f32.mrf.mxu0 }
 0x128   :  { %v751_v51 = vmax.f32 %v671_v47, 0.0  ;;  %v437_v52 = vadd.f32 %v436_v29, %v2079_v45 }
 0x129   :  { %v525_v53 = vpop.f32.mrf.mxu1 }
 0x12a   :  { %v813_v55 = vpack.c.bf16 %v751_v51, %v749_v11  ;;  %712 = vmatmul.bf16.gmra.mxu3 %v2092_v5  ;;  %989 = vmatmul.bf16.gmra.mxu0 %v2102_v24  ;;  %v526_v23 = vadd.f32 %v525_v53, %v437_v52  ;;  %v2195_v15 = vpop.f32.mrf.mxu2  ;;  %v587_v5 = vadd.f32 %v586_v9, %v2178_v30 }
 0x12c   :  { %1073 = vmatmul.bf16.vlgmr.msrb.gmra.mxu1 %v813_v55  ;;  %v776_v8 = vmax.f32 %v526_v23, 0.0 }
 0x12d   :  { %v673_v38 = vpop.f32.mrf.mxu3 }
 0x12e   :  { %v674_v16 = vadd.f32 %v673_v38, %v585_v3 }
 0x12f   :  { %v438_v62 = vpop.f32.mrf.mxu0 }
 0x130   :  { %v439_v4 = vadd.f32 %v438_v62, %v2079_v45  ;;  %v753_v20 = vmax.f32 %v674_v16, 0.0  ;;  %v595_v62 = vadd.f32 %v2183_v2, %v2178_v30 }
 0x131   :  { %v527_v7 = vpop.f32.mrf.mxu1 }
 0x132   :  { %v528_v18 = vadd.f32 %v527_v7, %v439_v4  ;;  %v601_v32 = vpop.f32.mrf.mxu2 }
 0x134   :  { %v778_v24 = vmax.f32 %v528_v18, 0.0 }
 0x135   :  { %v675_v56 = vpop.f32.mrf.mxu3 }
 0x136   :  { %v676_v17 = vadd.f32 %v675_v56, %v587_v5  ;;  %v2198_v35 = vpack.c.bf16 %v778_v24, %v776_v8  ;;  %v597_v5 = vadd.f32 %v596_v59, %v2178_v30 }
 0x137   :  { %v441_v60 = vpop.f32.mrf.mxu0 }
 0x138   :  { %v755_v22 = vmax.f32 %v676_v17, 0.0  ;;  %v442_v50 = vadd.f32 %v441_v60, %v2079_v45 }
 0x139   :  { %v530_v14 = vpop.f32.mrf.mxu1 }
 0x13a   :  { %717 = vmatmul.bf16.gmra.mxu3 %v2105_v27  ;;  %994 = vmatmul.bf16.gmra.mxu0 %v2115_v54  ;;  %v815_v13 = vpack.c.bf16 %v755_v22, %v753_v20  ;;  %v531_v31 = vadd.f32 %v530_v14, %v442_v50  ;;  %v592_v27 = vadd.f32 %v2174_v25, %v2178_v30  ;;  %v2210_v11 = vpop.f32.mrf.mxu2  ;;  %v1745_v14 = vld [vmem:[#allocation9 + $0x20] sm:$0xff] }
 0x13b   :  { %1273 = vmatpush.bf16.msrb.mxu2 %v1745_v14 }
 0x13c   :  { %1078 = vmatmul.bf16.gmra.mxu1 %v815_v13  ;;  %v780_v42 = vmax.f32 %v531_v31, 0.0 }
 0x13d   :  { %v678_v9 = vpop.f32.mrf.mxu3 }
 0x13e   :  { %v679_v46 = vadd.f32 %v678_v9, %v590_v21  ;;  %v600_v9 = vadd.f32 %v2195_v15, %v2178_v30 }
 0x13f   :  { %v443_v37 = vpop.f32.mrf.mxu0 }
 0x140   :  { %v444_v41 = vadd.f32 %v443_v37, %v2079_v45  ;;  %v757_v51 = vmax.f32 %v679_v46, 0.0 }
 0x141   :  { %v532_v48 = vpop.f32.mrf.mxu1 }
 0x142   :  { %v533_v26 = vadd.f32 %v532_v48, %v444_v41  ;;  %v606_v7 = vpop.f32.mrf.mxu2 }
 0x144   :  { %v782_v54 = vmax.f32 %v533_v26, 0.0 }
 0x145   :  { %v680_v63 = vpop.f32.mrf.mxu3 }
 0x146   :  { %v681_v57 = vadd.f32 %v680_v63, %v592_v27  ;;  %v2208_v47 = vpack.c.bf16 %v782_v54, %v780_v42 }
 0x147   :  { %v446_v29 = vpop.f32.mrf.mxu0 }
 0x148   :  { %v759_v52 = vmax.f32 %v681_v57, 0.0  ;;  %v447_v10 = vadd.f32 %v446_v29, %v2079_v45 }
 0x149   :  { %v535_v53 = vpop.f32.mrf.mxu1 }
 0x14a   :  { %722 = vmatmul.bf16.gmra.mxu3 %v2118_v61  ;;  %999 = vmatmul.bf16.gmra.mxu0 %v2134_v28  ;;  %v817_v55 = vpack.c.bf16 %v759_v52, %v757_v51  ;;  %v536_v25 = vadd.f32 %v535_v53, %v447_v10  ;;  %v609_v59 = vpop.f32.mrf.mxu2 }
 0x14c   :  { %1083 = vmatmul.bf16.gmra.mxu1 %v817_v55  ;;  %v784_v8 = vmax.f32 %v536_v25, 0.0  ;;  %v605_v25 = vadd.f32 %v2210_v11, %v2178_v30 }
 0x14d   :  { %v683_v23 = vpop.f32.mrf.mxu3 }
 0x14e   :  { %v684_v16 = vadd.f32 %v683_v23, %v595_v62 }
 0x14f   :  { %v448_v38 = vpop.f32.mrf.mxu0 }
 0x150   :  { %v449_v3 = vadd.f32 %v448_v38, %v2079_v45  ;;  %v761_v60 = vmax.f32 %v684_v16, 0.0  ;;  %v1744_v38 = vld [vmem:[#allocation9 + $0x18] sm:$0xff] }
 0x151   :  { %v537_v4 = vpop.f32.mrf.mxu1  ;;  %1274 = vmatpush.bf16.msrb.mxu2 %v1744_v38 }
 0x152   :  { %v538_v18 = vadd.f32 %v537_v4, %v449_v3  ;;  %v611_v27 = vpop.f32.mrf.mxu2 }
 0x154   :  { %v786_v61 = vmax.f32 %v538_v18, 0.0 }
 0x155   :  { %v685_v24 = vpop.f32.mrf.mxu3 }
 0x156   :  { %v686_v28 = vadd.f32 %v685_v24, %v597_v5  ;;  %v2219_v56 = vpack.c.bf16 %v786_v61, %v784_v8 }
 0x157   :  { %v451_v17 = vpop.f32.mrf.mxu0 }
 0x158   :  { %v763_v20 = vmax.f32 %v686_v28, 0.0  ;;  %v452_v22 = vadd.f32 %v451_v17, %v2079_v45 }
 0x159   :  { %v540_v2 = vpop.f32.mrf.mxu1 }
 0x15a   :  { %727 = vmatmul.bf16.gmra.mxu3 %v2137_v33  ;;  %1004 = vmatmul.bf16.gmra.mxu0 %v2154_v0  ;;  %v819_v50 = vpack.c.bf16 %v763_v20, %v761_v60  ;;  %v541_v44 = vadd.f32 %v540_v2, %v452_v22  ;;  %v602_v33 = vadd.f32 %v601_v32, %v2178_v30  ;;  %v614_v55 = vpop.f32.mrf.mxu2 }
 0x15c   :  { %1088 = vmatmul.bf16.gmra.mxu1 %v819_v50  ;;  %v788_v41 = vmax.f32 %v541_v44, 0.0  ;;  %v610_v50 = vadd.f32 %v609_v59, %v2178_v30 }
 0x15d   :  { %v688_v13 = vpop.f32.mrf.mxu3 }
 0x15e   :  { %v689_v42 = vadd.f32 %v688_v13, %v600_v9 }
 0x15f   :  { %v453_v31 = vpop.f32.mrf.mxu0 }
 0x160   :  { %v454_v37 = vadd.f32 %v453_v31, %v2079_v45  ;;  %v765_v57 = vmax.f32 %v689_v42, 0.0 }
 0x161   :  { %v542_v21 = vpop.f32.mrf.mxu1 }
 0x162   :  { %v543_v48 = vadd.f32 %v542_v21, %v454_v37  ;;  %v616_v60 = vpop.f32.mrf.mxu2  ;;  %v612_v37 = vadd.f32 %v611_v27, %v2178_v30 }
 0x164   :  { %v790_v0 = vmax.f32 %v543_v48, 0.0 }
 0x165   :  { %v690_v26 = vpop.f32.mrf.mxu3 }
 0x166   :  { %v691_v46 = vadd.f32 %v690_v26, %v602_v33  ;;  %v2228_v54 = vpack.c.bf16 %v790_v0, %v788_v41 }
 0x167   :  { %v456_v63 = vpop.f32.mrf.mxu0 }
 0x168   :  { %v767_v29 = vmax.f32 %v691_v46, 0.0  ;;  %v457_v51 = vadd.f32 %v456_v63, %v2079_v45 }
 0x169   :  { %v545_v15 = vpop.f32.mrf.mxu1 }
 0x16a   :  { %732 = vmatmul.bf16.gmra.mxu3 %v2157_v6  ;;  %1009 = vmatmul.bf16.gmra.mxu0 %v2169_v36  ;;  %v821_v52 = vpack.c.bf16 %v767_v29, %v765_v57  ;;  %v546_v10 = vadd.f32 %v545_v15, %v457_v51  ;;  %v607_v6 = vadd.f32 %v606_v7, %v2178_v30  ;;  %v619_v9 = vpop.f32.mrf.mxu2  ;;  %v1743_v57 = vld [vmem:[#allocation9 + $0x10] sm:$0xff]  ;;  %v1742_v15 = vld [vmem:[#allocation9 + $0x8] sm:$0xff] }
 0x16b   :  { %1275 = vmatpush.bf16.msrb.mxu2 %v1743_v57 }
 0x16c   :  { %1093 = vmatmul.bf16.gmra.mxu1 %v821_v52  ;;  %v792_v3 = vmax.f32 %v546_v10, 0.0  ;;  %v615_v52 = vadd.f32 %v614_v55, %v2178_v30 }
 0x16d   :  { %v693_v32 = vpop.f32.mrf.mxu3 }
 0x16e   :  { %v694_v8 = vadd.f32 %v693_v32, %v605_v25 }
 0x16f   :  { %v458_v53 = vpop.f32.mrf.mxu0  ;;  %1276 = vmatpush.bf16.msrb.mxu2 %v1742_v15 }
 0x170   :  { %v459_v23 = vadd.f32 %v458_v53, %v2079_v45  ;;  %v769_v24 = vmax.f32 %v694_v8, 0.0 }
 0x171   :  { %v547_v62 = vpop.f32.mrf.mxu1 }
 0x172   :  { %v548_v4 = vadd.f32 %v547_v62, %v459_v23  ;;  %v621_v29 = vpop.f32.mrf.mxu2  ;;  %v1741_v23 = vld [vmem:[#allocation9] sm:$0xff] }
 0x173   :  { %1277 = vmatpush.bf16.msrb.mxu2 %v1741_v23 }
 0x174   :  { %v794_v36 = vmax.f32 %v548_v4, 0.0 }
 0x175   :  { %v695_v18 = vpop.f32.mrf.mxu3 }
 0x176   :  { %v696_v5 = vadd.f32 %v695_v18, %v607_v6  ;;  %v2237_v16 = vpack.c.bf16 %v794_v36, %v792_v3 }
 0x177   :  { %v461_v61 = vpop.f32.mrf.mxu0 }
 0x178   :  { %v771_v28 = vmax.f32 %v696_v5, 0.0  ;;  %v462_v11 = vadd.f32 %v461_v61, %v2079_v45  ;;  %v620_v61 = vadd.f32 %v619_v9, %v2178_v30 }
 0x179   :  { %v550_v17 = vpop.f32.mrf.mxu1 }
 0x17a   :  { %v823_v20 = vpack.c.bf16 %v771_v28, %v769_v24  ;;  %737 = vmatmul.bf16.gmra.mxu3 %v2040_v34  ;;  %1014 = vmatmul.bf16.gmra.mxu0 %v2187_v49  ;;  %v551_v22 = vadd.f32 %v550_v17, %v462_v11  ;;  %v624_v8 = vpop.f32.mrf.mxu2  ;;  %v622_v11 = vadd.f32 %v621_v29, %v2178_v30 }
 0x17c   :  { %1098 = vmatmul.bf16.gmra.mxu1 %v823_v20  ;;  %v796_v13 = vmax.f32 %v551_v22, 0.0 }
 0x17d   :  { %v698_v7 = vpop.f32.mrf.mxu3 }
 0x17e   :  { %v699_v21 = vadd.f32 %v698_v7, %v610_v50  ;;  %v2261_v50 = vld [vmem:[%s2409_s4] ss:$0 sm:$0xff] }
 0x17f   :  { %v463_v2 = vpop.f32.mrf.mxu0 }
 0x180   :  { %v464_v44 = vadd.f32 %v463_v2, %v2079_v45  ;;  %v773_v42 = vmax.f32 %v699_v21, 0.0  ;;  %v625_v21 = vadd.f32 %v624_v8, %v2178_v30 }
 0x181   :  { %v552_v14 = vpop.f32.mrf.mxu1 }
 0x182   :  { %v553_v31 = vadd.f32 %v552_v14, %v464_v44  ;;  %v626_v24 = vpop.f32.mrf.mxu2 }
 0x184   :  { %v798_v41 = vmax.f32 %v553_v31, 0.0 }
 0x185   :  { %v700_v48 = vpop.f32.mrf.mxu3 }
 0x186   :  { %v701_v34 = vadd.f32 %v700_v48, %v612_v37  ;;  %v2245_v33 = vpack.c.bf16 %v798_v41, %v796_v13 }
 0x187   :  { %v466_v49 = vpop.f32.mrf.mxu0 }
 0x188   :  { %v775_v0 = vmax.f32 %v701_v34, 0.0  ;;  %v467_v26 = vadd.f32 %v466_v49, %v2079_v45 }
 0x189   :  { %v555_v59 = vpop.f32.mrf.mxu1 }
 0x18a   :  { %v825_v46 = vpack.c.bf16 %v775_v0, %v773_v42  ;;  %742 = vmatmul.bf16.gmra.mxu3 %v2049_v43  ;;  %1019 = vmatmul.bf16.gmra.mxu0 %v2198_v35  ;;  %v556_v63 = vadd.f32 %v555_v59, %v467_v26  ;;  %v617_v43 = vadd.f32 %v616_v60, %v2178_v30  ;;  %v629_v44 = vpop.f32.mrf.mxu2 }
 0x18b   :  { %v627_v0 = vadd.f32 %v626_v24, %v2178_v30  ;;  %v630_v23 = vadd.f32 %v629_v44, %v2178_v30 }
 0x18c   :  { %1103 = vmatmul.bf16.gmra.mxu1 %v825_v46  ;;  %v800_v53 = vmax.f32 %v556_v63, 0.0 }
 0x18d   :  { %v703_v27 = vpop.f32.mrf.mxu3 }
 0x18e   :  { %v704_v35 = vadd.f32 %v703_v27, %v615_v52 }
 0x18f   :  { %v468_v51 = vpop.f32.mrf.mxu0 }
 0x190   :  { %v469_v10 = vadd.f32 %v468_v51, %v2079_v45  ;;  %v777_v36 = vmax.f32 %v704_v35, 0.0 }
 0x191   :  { %v557_v32 = vpop.f32.mrf.mxu1 }
 0x192   :  { %v558_v25 = vadd.f32 %v557_v32, %v469_v10 }
 0x194   :  { %v802_v38 = vmax.f32 %v558_v25, 0.0 }
 0x195   :  { %v705_v62 = vpop.f32.mrf.mxu3 }
 0x196   :  { %v706_v3 = vadd.f32 %v705_v62, %v617_v43  ;;  %v2253_v4 = vpack.c.bf16 %v802_v38, %v800_v53 }
 0x197   :  { %v985_v6 = vpop.f32.mrf.mxu0 }
 0x198   :  { %v779_v55 = vmax.f32 %v706_v3, 0.0  ;;  %v986_v13 = vadd.f32 %v2261_v50, %v985_v6 }
 0x19a   :  { %v827_v18 = vpack.c.bf16 %v779_v55, %v777_v36  ;;  %1024 = vmatmul.bf16.gmra.mxu0 %v2208_v47 }
 0x19c   :  { %1108 = vmatmul.bf16.gmra.mxu1 %v827_v18 }
 0x19d   :  { %v708_v45 = vpop.f32.mrf.mxu3 }
 0x19e   :  { %v709_v28 = vadd.f32 %v708_v45, %v620_v61 }
 0x19f   :  { %v987_v5 = vpop.f32.mrf.mxu0 }
 0x1a0   :  { %v781_v22 = vmax.f32 %v709_v28, 0.0  ;;  %v988_v9 = vadd.f32 %v2261_v50, %v987_v5 }
 0x1a5   :  { %v710_v17 = vpop.f32.mrf.mxu3 }
 0x1a6   :  { %v711_v60 = vadd.f32 %v710_v17, %v622_v11 }
 0x1a7   :  { %v990_v20 = vpop.f32.mrf.mxu0 }
 0x1a8   :  { %v783_v7 = vmax.f32 %v711_v60, 0.0  ;;  %v991_v52 = vadd.f32 %v2261_v50, %v990_v20 }
 0x1a9   :  { %v1074_v2 = vpop.f32.mrf.mxu1 }
 0x1aa   :  { %v829_v47 = vpack.c.bf16 %v783_v7, %v781_v22  ;;  %1029 = vmatmul.bf16.gmra.mxu0 %v2219_v56  ;;  %v1075_v37 = vadd.f32 %v1074_v2, %v986_v13  ;;  %v631_v56 = vpop.f32.mrf.mxu2 }
 0x1ab   :  { %v632_v6 = vadd.f32 %v631_v56, %v2178_v30 }
 0x1ac   :  { %1113 = vmatmul.bf16.gmra.mxu1 %v829_v47  ;;  %v1154_v34 = vmax.f32 %v1075_v37, 0.0 }
 0x1ad   :  { %v713_v14 = vpop.f32.mrf.mxu3 }
 0x1ae   :  { %v714_v49 = vadd.f32 %v713_v14, %v625_v21 }
 0x1af   :  { %v992_v31 = vpop.f32.mrf.mxu0 }
 0x1b0   :  { %v785_v57 = vmax.f32 %v714_v49, 0.0  ;;  %v993_v53 = vadd.f32 %v2261_v50, %v992_v31 }
 0x1b1   :  { %v1076_v41 = vpop.f32.mrf.mxu1 }
 0x1b2   :  { %v1077_v48 = vadd.f32 %v1076_v41, %v988_v9  ;;  %v634_v32 = vpop.f32.mrf.mxu2 }
 0x1b3   :  { %v635_v22 = vadd.f32 %v634_v32, %v2178_v30 }
 0x1b4   :  { %v1155_v42 = vmax.f32 %v1077_v48, 0.0 }
 0x1b5   :  { %v715_v26 = vpop.f32.mrf.mxu3 }
 0x1b6   :  { %v1186_v59 = vpack.c.bf16 %v1155_v42, %v1154_v34  ;;  %v716_v46 = vadd.f32 %v715_v26, %v627_v0 }
 0x1b7   :  { %v995_v63 = vpop.f32.mrf.mxu0 }
 0x1b8   :  { %v787_v27 = vmax.f32 %v716_v46, 0.0  ;;  %1278 = vmatmul.bf16.vlgmr.msrb.gmra.mxu2 %v1186_v59  ;;  %v996_v11 = vadd.f32 %v2261_v50, %v995_v63 }
 0x1b9   :  { %v1079_v29 = vpop.f32.mrf.mxu1 }
 0x1ba   :  { %v831_v51 = vpack.c.bf16 %v787_v27, %v785_v57  ;;  %1034 = vmatmul.bf16.gmra.mxu0 %v2228_v54  ;;  %v1080_v25 = vadd.f32 %v1079_v29, %v991_v52  ;;  %v636_v61 = vpop.f32.mrf.mxu2 }
 0x1bb   :  { %v637_v31 = vadd.f32 %v636_v61, %v2178_v30 }
 0x1bc   :  { %1118 = vmatmul.bf16.gmra.mxu1 %v831_v51  ;;  %v1156_v38 = vmax.f32 %v1080_v25, 0.0 }
 0x1bd   :  { %v718_v15 = vpop.f32.mrf.mxu3 }
 0x1be   :  { %v719_v62 = vadd.f32 %v718_v15, %v630_v23 }
 0x1bf   :  { %v997_v10 = vpop.f32.mrf.mxu0 }
 0x1c0   :  { %v789_v18 = vmax.f32 %v719_v62, 0.0  ;;  %v998_v60 = vadd.f32 %v2261_v50, %v997_v10 }
 0x1c1   :  { %v1081_v43 = vpop.f32.mrf.mxu1 }
 0x1c2   :  { %v1082_v35 = vadd.f32 %v1081_v43, %v993_v53  ;;  %v639_v47 = vpop.f32.mrf.mxu2 }
 0x1c3   :  { %v640_v63 = vadd.f32 %v639_v47, %v2178_v30 }
 0x1c4   :  { %v1157_v3 = vmax.f32 %v1082_v35, 0.0 }
 0x1c5   :  { %v720_v8 = vpop.f32.mrf.mxu3 }
 0x1c6   :  { %v721_v54 = vadd.f32 %v720_v8, %v632_v6  ;;  %v1187_v36 = vpack.c.bf16 %v1157_v3, %v1156_v38 }
 0x1c7   :  { %v1000_v55 = vpop.f32.mrf.mxu0 }
 0x1c8   :  { %v791_v45 = vmax.f32 %v721_v54, 0.0  ;;  %1283 = vmatmul.bf16.gmra.mxu2 %v1187_v36  ;;  %v1001_v26 = vadd.f32 %v2261_v50, %v1000_v55 }
 0x1c9   :  { %v1084_v5 = vpop.f32.mrf.mxu1 }
 0x1ca   :  { %v833_v24 = vpack.c.bf16 %v791_v45, %v789_v18  ;;  %1039 = vmatmul.bf16.gmra.mxu0 %v2237_v16  ;;  %v1085_v20 = vadd.f32 %v1084_v5, %v996_v11  ;;  %v641_v0 = vpop.f32.mrf.mxu2 }
 0x1cb   :  { %v642_v52 = vadd.f32 %v641_v0, %v2178_v30 }
 0x1cc   :  { %1123 = vmatmul.bf16.gmra.mxu1 %v833_v24  ;;  %v1158_v44 = vmax.f32 %v1085_v20, 0.0 }
 0x1cd   :  { %v723_v28 = vpop.f32.mrf.mxu3 }
 0x1ce   :  { %v724_v14 = vadd.f32 %v723_v28, %v635_v22 }
 0x1cf   :  { %v1002_v17 = vpop.f32.mrf.mxu0 }
 0x1d0   :  { %v793_v41 = vmax.f32 %v724_v14, 0.0  ;;  %v1003_v59 = vadd.f32 %v2261_v50, %v1002_v17 }
 0x1d1   :  { %v1086_v7 = vpop.f32.mrf.mxu1 }
 0x1d2   :  { %v1087_v2 = vadd.f32 %v1086_v7, %v998_v60  ;;  %v644_v25 = vpop.f32.mrf.mxu2 }
 0x1d3   :  { %v645_v36 = vadd.f32 %v644_v25, %v2178_v30 }
 0x1d4   :  { %v1159_v13 = vmax.f32 %v1087_v2, 0.0 }
 0x1d5   :  { %v725_v9 = vpop.f32.mrf.mxu3 }
 0x1d6   :  { %v726_v16 = vadd.f32 %v725_v9, %v637_v31  ;;  %v1188_v37 = vpack.c.bf16 %v1159_v13, %v1158_v44 }
 0x1d7   :  { %v1005_v21 = vpop.f32.mrf.mxu0 }
 0x1d8   :  { %v795_v48 = vmax.f32 %v726_v16, 0.0  ;;  %1288 = vmatmul.bf16.gmra.mxu2 %v1188_v37  ;;  %v1006_v3 = vadd.f32 %v2261_v50, %v1005_v21  ;;  %v650_v16 = vadd.f32 %v2147_v40, %v2178_v30  ;;  %v652_v21 = vadd.f32 %v2152_v58, %v2178_v30 }
 0x1d9   :  { %v1089_v34 = vpop.f32.mrf.mxu1 }
 0x1da   :  { %v835_v49 = vpack.c.bf16 %v795_v48, %v793_v41  ;;  %1044 = vmatmul.bf16.gmra.mxu0 %v2245_v33  ;;  %v1090_v46 = vadd.f32 %v1089_v34, %v1001_v26  ;;  %v646_v18 = vpop.f32.mrf.mxu2 }
 0x1db   :  { %v647_v28 = vadd.f32 %v646_v18, %v2178_v30 }
 0x1dc   :  { %1128 = vmatmul.bf16.gmra.mxu1 %v835_v49  ;;  %v1160_v29 = vmax.f32 %v1090_v46, 0.0 }
 0x1dd   :  { %v728_v42 = vpop.f32.mrf.mxu3 }
 0x1de   :  { %v729_v51 = vadd.f32 %v728_v42, %v640_v63 }
 0x1df   :  { %v1007_v56 = vpop.f32.mrf.mxu0 }
 0x1e0   :  { %v797_v23 = vmax.f32 %v729_v51, 0.0  ;;  %v1008_v8 = vadd.f32 %v2261_v50, %v1007_v56  ;;  %v655_v51 = vadd.f32 %v2162_v12, %v2178_v30 }
 0x1e1   :  { %v1091_v57 = vpop.f32.mrf.mxu1 }
 0x1e2   :  { %v1092_v27 = vadd.f32 %v1091_v57, %v1003_v59 }
 0x1e4   :  { %v1161_v15 = vmax.f32 %v1092_v27, 0.0 }
 0x1e5   :  { %v730_v10 = vpop.f32.mrf.mxu3 }
 0x1e6   :  { %v731_v33 = vadd.f32 %v730_v10, %v642_v52  ;;  %v1189_v32 = vpack.c.bf16 %v1161_v15, %v1160_v29  ;;  %v657_v52 = vadd.f32 %v2167_v19, %v2178_v30 }
 0x1e7   :  { %v1010_v53 = vpop.f32.mrf.mxu0 }
 0x1e8   :  { %v799_v43 = vmax.f32 %v731_v33, 0.0  ;;  %1293 = vmatmul.bf16.gmra.mxu2 %v1189_v32  ;;  %v1011_v44 = vadd.f32 %v2261_v50, %v1010_v53 }
 0x1e9   :  { %v1094_v35 = vpop.f32.mrf.mxu1 }
 0x1ea   :  { %v837_v38 = vpack.c.bf16 %v799_v43, %v797_v23  ;;  %1049 = vmatmul.bf16.gmra.mxu0 %v2253_v4  ;;  %v1095_v54 = vadd.f32 %v1094_v35, %v1006_v3 }
 0x1ec   :  { %1133 = vmatmul.bf16.gmra.mxu1 %v837_v38  ;;  %v1162_v5 = vmax.f32 %v1095_v54, 0.0 }
 0x1ed   :  { %v733_v62 = vpop.f32.mrf.mxu3 }
 0x1ee   :  { %v734_v61 = vadd.f32 %v733_v62, %v645_v36 }
 0x1ef   :  { %v1012_v6 = vpop.f32.mrf.mxu0 }
 0x1f0   :  { %v801_v20 = vmax.f32 %v734_v61, 0.0  ;;  %v1013_v13 = vadd.f32 %v2261_v50, %v1012_v6 }
 0x1f1   :  { %v1096_v55 = vpop.f32.mrf.mxu1 }
 0x1f2   :  { %v1097_v45 = vadd.f32 %v1096_v55, %v1008_v8 }
 0x1f4   :  { %v1163_v24 = vmax.f32 %v1097_v45, 0.0 }
 0x1f5   :  { %v735_v11 = vpop.f32.mrf.mxu3 }
 0x1f6   :  { %v1190_v4 = vpack.c.bf16 %v1163_v24, %v1162_v5  ;;  %v736_v17 = vadd.f32 %v735_v11, %v647_v28 }
 0x1f7   :  { %v1015_v60 = vpop.f32.mrf.mxu0 }
 0x1f8   :  { %v803_v22 = vmax.f32 %v736_v17, 0.0  ;;  %1298 = vmatmul.bf16.gmra.mxu2 %v1190_v4  ;;  %v1016_v63 = vadd.f32 %v2261_v50, %v1015_v60 }
 0x1f9   :  { %v1099_v7 = vpop.f32.mrf.mxu1 }
 0x1fa   :  { %v839_v2 = vpack.c.bf16 %v803_v22, %v801_v20  ;;  %1054 = vmatmul.bf16.gmra.mxu0 %v2122_v1  ;;  %v1100_v31 = vadd.f32 %v1099_v7, %v1011_v44 }
 0x1fc   :  { %1138 = vmatmul.bf16.gmra.mxu1 %v839_v2  ;;  %v1164_v41 = vmax.f32 %v1100_v31, 0.0 }
 0x1fd   :  { %v738_v47 = vpop.f32.mrf.mxu3 }
 0x1fe   :  { %v739_v48 = vadd.f32 %v738_v47, %v650_v16 }
 0x1ff   :  { %v1017_v14 = vpop.f32.mrf.mxu0 }
 0x200   :  { %v805_v26 = vmax.f32 %v739_v48, 0.0  ;;  %v1018_v58 = vadd.f32 %v2261_v50, %v1017_v14 }
 0x201   :  { %v1101_v9 = vpop.f32.mrf.mxu1 }
 0x202   :  { %v1102_v37 = vadd.f32 %v1101_v9, %v1013_v13 }
 0x204   :  { %v1165_v34 = vmax.f32 %v1102_v37, 0.0 }
 0x205   :  { %v740_v1 = vpop.f32.mrf.mxu3 }
 0x206   :  { %v1191_v49 = vpack.c.bf16 %v1165_v34, %v1164_v41  ;;  %v741_v42 = vadd.f32 %v740_v1, %v652_v21 }
 0x207   :  { %v1020_v0 = vpop.f32.mrf.mxu0 }
 0x208   :  { %v807_v56 = vmax.f32 %v741_v42, 0.0  ;;  %1303 = vmatmul.bf16.gmra.mxu2 %v1191_v49  ;;  %v1021_v3 = vadd.f32 %v2261_v50, %v1020_v0 }
 0x209   :  { %v1104_v59 = vpop.f32.mrf.mxu1 }
 0x20a   :  { %v841_v46 = vpack.c.bf16 %v807_v56, %v805_v26  ;;  %1059 = vmatmul.bf16.gmra.mxu0 %v2143_v39  ;;  %v1105_v27 = vadd.f32 %v1104_v59, %v1016_v63 }
 0x20c   :  { %1143 = vmatmul.bf16.gmra.mxu1 %v841_v46  ;;  %v1166_v10 = vmax.f32 %v1105_v27, 0.0 }
 0x20d   :  { %v743_v40 = vpop.f32.mrf.mxu3 }
 0x20e   :  { %v744_v33 = vadd.f32 %v743_v40, %v655_v51 }
 0x20f   :  { %v1022_v57 = vpop.f32.mrf.mxu0 }
 0x210   :  { %v809_v43 = vmax.f32 %v744_v33, 0.0  ;;  %v1023_v6 = vadd.f32 %v2261_v50, %v1022_v57 }
 0x211   :  { %v1106_v29 = vpop.f32.mrf.mxu1 }
 0x212   :  { %v1107_v15 = vadd.f32 %v1106_v29, %v1018_v58 }
 0x214   :  { %v1167_v32 = vmax.f32 %v1107_v15, 0.0 }
 0x215   :  { %v745_v39 = vpop.f32.mrf.mxu3 }
 0x216   :  { %v1192_v53 = vpack.c.bf16 %v1167_v32, %v1166_v10  ;;  %v746_v25 = vadd.f32 %v745_v39, %v657_v52 }
 0x217   :  { %v1025_v23 = vpop.f32.mrf.mxu0 }
 0x218   :  { %v811_v35 = vmax.f32 %v746_v25, 0.0  ;;  %1308 = vmatmul.bf16.gmra.mxu2 %v1192_v53  ;;  %v1026_v5 = vadd.f32 %v2261_v50, %v1025_v23 }
 0x219   :  { %v1109_v38 = vpop.f32.mrf.mxu1 }
 0x21a   :  { %v843_v62 = vpack.c.bf16 %v811_v35, %v809_v43  ;;  %v1110_v8 = vadd.f32 %v1109_v38, %v1021_v3 }
 0x21c   :  { %1148 = vmatmul.bf16.gmra.mxu1 %v843_v62  ;;  %v1168_v54 = vmax.f32 %v1110_v8, 0.0 }
 0x21f   :  { %v1027_v12 = vpop.f32.mrf.mxu0 }
 0x220   :  { %v1028_v24 = vadd.f32 %v2261_v50, %v1027_v12 }
 0x221   :  { %v1111_v19 = vpop.f32.mrf.mxu1 }
 0x222   :  { %v1112_v30 = vadd.f32 %v1111_v19, %v1023_v6 }
 0x224   :  { %v1169_v36 = vmax.f32 %v1112_v30, 0.0 }
 0x226   :  { %v1193_v55 = vpack.c.bf16 %v1169_v36, %v1168_v54 }
 0x227   :  { %v1030_v18 = vpop.f32.mrf.mxu0 }
 0x228   :  { %1313 = vmatmul.bf16.gmra.mxu2 %v1193_v55  ;;  %v1031_v47 = vadd.f32 %v2261_v50, %v1030_v18 }
 0x229   :  { %v1114_v45 = vpop.f32.mrf.mxu1 }
 0x22a   :  { %v1115_v28 = vadd.f32 %v1114_v45, %v1026_v5 }
 0x22c   :  { %v1170_v17 = vmax.f32 %v1115_v28, 0.0 }
 0x22f   :  { %v1032_v61 = vpop.f32.mrf.mxu0 }
 0x230   :  { %v1033_v14 = vadd.f32 %v2261_v50, %v1032_v61 }
 0x231   :  { %v1116_v11 = vpop.f32.mrf.mxu1 }
 0x232   :  { %v1117_v4 = vadd.f32 %v1116_v11, %v1028_v24 }
 0x234   :  { %v1171_v60 = vmax.f32 %v1117_v4, 0.0 }
 0x236   :  { %v1194_v20 = vpack.c.bf16 %v1171_v60, %v1170_v17 }
 0x237   :  { %v1035_v22 = vpop.f32.mrf.mxu0 }
 0x238   :  { %1318 = vmatmul.bf16.gmra.mxu2 %v1194_v20  ;;  %v1036_v49 = vadd.f32 %v2261_v50, %v1035_v22 }
 0x239   :  { %v1119_v7 = vpop.f32.mrf.mxu1 }
 0x23a   :  { %v1120_v13 = vadd.f32 %v1119_v7, %v1031_v47 }
 0x23b   :  { %v2306_v2 = vpop.f32.mrf.mxu2 }
 0x23c   :  { %v1172_v37 = vmax.f32 %v1120_v13, 0.0 }
 0x23f   :  { %v1037_v44 = vpop.f32.mrf.mxu0 }
 0x240   :  { %v1038_v0 = vadd.f32 %v2261_v50, %v1037_v44 }
 0x241   :  { %v1121_v31 = vpop.f32.mrf.mxu1 }
 0x242   :  { %v1122_v9 = vadd.f32 %v1121_v31, %v1033_v14 }
 0x243   :  { %v2310_v16 = vpop.f32.mrf.mxu2 }
 0x244   :  { %v1173_v21 = vmax.f32 %v1122_v9, 0.0 }
 0x246   :  { %v1195_v41 = vpack.c.bf16 %v1173_v21, %v1172_v37 }
 0x247   :  { %v1040_v48 = vpop.f32.mrf.mxu0 }
 0x248   :  { %1323 = vmatmul.bf16.gmra.mxu2 %v1195_v41  ;;  %v1041_v51 = vadd.f32 %v2261_v50, %v1040_v48 }
 0x249   :  { %v1124_v34 = vpop.f32.mrf.mxu1 }
 0x24a   :  { %v1125_v26 = vadd.f32 %v1124_v34, %v1036_v49 }
 0x24b   :  { %v2312_v1 = vpop.f32.mrf.mxu2 }
 0x24c   :  { %v1174_v40 = vmax.f32 %v1125_v26, 0.0 }
 0x24f   :  { %v1042_v42 = vpop.f32.mrf.mxu0 }
 0x250   :  { %v1043_v15 = vadd.f32 %v2261_v50, %v1042_v42 }
 0x251   :  { %v1126_v56 = vpop.f32.mrf.mxu1 }
 0x252   :  { %v1127_v59 = vadd.f32 %v1126_v56, %v1038_v0 }
 0x253   :  { %v2316_v46 = vpop.f32.mrf.mxu2 }
 0x254   :  { %v1175_v63 = vmax.f32 %v1127_v59, 0.0 }
 0x256   :  { %v1196_v57 = vpack.c.bf16 %v1175_v63, %v1174_v40 }
 0x257   :  { %v1045_v58 = vpop.f32.mrf.mxu0 }
 0x258   :  { %1328 = vmatmul.bf16.gmra.mxu2 %v1196_v57  ;;  %v1046_v62 = vadd.f32 %v2261_v50, %v1045_v58 }
 0x259   :  { %v1129_v27 = vpop.f32.mrf.mxu1 }
 0x25a   :  { %v1130_v52 = vadd.f32 %v1129_v27, %v1041_v51 }
 0x25b   :  { %v2318_v29 = vpop.f32.mrf.mxu2 }
 0x25c   :  { %v1176_v53 = vmax.f32 %v1130_v52, 0.0 }
 0x25f   :  { %v1047_v10 = vpop.f32.mrf.mxu0 }
 0x260   :  { %v1048_v3 = vadd.f32 %v2261_v50, %v1047_v10  ;;  %v2341_v10 = vld [vmem:[%s2411_s6] ss:$0 sm:$0xff] }
 0x261   :  { %v1131_v33 = vpop.f32.mrf.mxu1 }
 0x262   :  { %v1132_v32 = vadd.f32 %v1131_v33, %v1043_v15 }
 0x263   :  { %v2322_v39 = vpop.f32.mrf.mxu2 }
 0x264   :  { %v1177_v25 = vmax.f32 %v1132_v32, 0.0 }
 0x266   :  { %v1197_v23 = vpack.c.bf16 %v1177_v25, %v1176_v53 }
 0x267   :  { %v1050_v35 = vpop.f32.mrf.mxu0 }
 0x268   :  { %1333 = vmatmul.bf16.gmra.mxu2 %v1197_v23  ;;  %v1051_v5 = vadd.f32 %v2261_v50, %v1050_v35 }
 0x269   :  { %v1134_v43 = vpop.f32.mrf.mxu1 }
 0x26a   :  { %v1135_v12 = vadd.f32 %v1134_v43, %v1046_v62 }
 0x26b   :  { %v2324_v38 = vpop.f32.mrf.mxu2 }
 0x26c   :  { %v1178_v30 = vmax.f32 %v1135_v12, 0.0 }
 0x26f   :  { %v1052_v36 = vpop.f32.mrf.mxu0 }
 0x270   :  { %v1053_v24 = vadd.f32 %v2261_v50, %v1052_v36 }
 0x271   :  { %v1136_v6 = vpop.f32.mrf.mxu1 }
 0x272   :  { %v1137_v8 = vadd.f32 %v1136_v6, %v1048_v3 }
 0x273   :  { %v2328_v19 = vpop.f32.mrf.mxu2 }
 0x274   :  { %v1179_v54 = vmax.f32 %v1137_v8, 0.0 }
 0x276   :  { %v1198_v55 = vpack.c.bf16 %v1179_v54, %v1178_v30 }
 0x277   :  { %v1055_v61 = vpop.f32.mrf.mxu0 }
 0x278   :  { %1338 = vmatmul.bf16.gmra.mxu2 %v1198_v55  ;;  %v1056_v14 = vadd.f32 %v2261_v50, %v1055_v61  ;;  %v1297_v61 = vadd.f32 %v2341_v10, %v2328_v19 }
 0x279   :  { %v1139_v18 = vpop.f32.mrf.mxu1 }
 0x27a   :  { %v1140_v28 = vadd.f32 %v1139_v18, %v1051_v5 }
 0x27b   :  { %v2330_v45 = vpop.f32.mrf.mxu2 }
 0x27c   :  { %v1180_v60 = vmax.f32 %v1140_v28, 0.0  ;;  %v1300_v18 = vadd.f32 %v2341_v10, %v2330_v45  ;;  %v1290_v45 = vadd.f32 %v2341_v10, %v2318_v29  ;;  %v1280_v29 = vadd.f32 %v2341_v10, %v2306_v2 }
 0x27f   :  { %v1057_v7 = vpop.f32.mrf.mxu0 }
 0x280   :  { %v1058_v13 = vadd.f32 %v2261_v50, %v1057_v7  ;;  %v1363_v7 = vmax.f32 %v1290_v45, 0.0  ;;  %v1445_v45 = vlaneseq }
 0x281   :  { %v1141_v11 = vpop.f32.mrf.mxu1 }
 0x282   :  { %v1142_v4 = vadd.f32 %v1141_v11, %v1053_v24  ;;  %v1367_v24 = vmax.f32 %v1300_v18, 0.0  ;;  %v1295_v11 = vadd.f32 %v2341_v10, %v2324_v38  ;;  %v1285_v38 = vadd.f32 %v2341_v10, %v2312_v1 }
 0x283   :  { %v1301_v17 = vpop.f32.mrf.mxu2  ;;  %vm1447_vm1 = vcmp.lt.s32.totalorder %v1445_v45, 256 }
 0x284   :  { %v1181_v20 = vmax.f32 %v1142_v4, 0.0  ;;  %v1302_v54 = vadd.f32 %v2341_v10, %v1301_v17  ;;  %v1366_v4 = vmax.f32 %v1297_v61, 0.0  ;;  %v1292_v17 = vadd.f32 %v2341_v10, %v2322_v39 }
 0x285   :  { %v1282_v39 = vadd.f32 %v2341_v10, %v2310_v16 }
 0x286   :  { %v1199_v22 = vpack.c.bf16 %v1181_v20, %v1180_v60  ;;  %v1368_v5 = vmax.f32 %v1302_v54, 0.0  ;;  %v1365_v60 = vmax.f32 %v1295_v11, 0.0  ;;  %v1364_v19 = vmax.f32 %v1292_v17, 0.0 }
 0x287   :  { %v1060_v21 = vpop.f32.mrf.mxu0 }
 0x288   :  { %1343 = vmatmul.bf16.gmra.mxu2 %v1199_v22  ;;  %v1061_v56 = vadd.f32 %v2261_v50, %v1060_v21  ;;  %v1287_v22 = vadd.f32 %v2341_v10, %v2316_v46  ;;  %v1359_v46 = vmax.f32 %v1280_v29, 0.0 }
 0x289   :  { %v1144_v47 = vpop.f32.mrf.mxu1 }
 0x28a   :  { %v1145_v31 = vadd.f32 %v1144_v47, %v1056_v14  ;;  %v1361_v14 = vmax.f32 %v1285_v38, 0.0 }
 0x28b   :  { %v1304_v44 = vpop.f32.mrf.mxu2 }
 0x28c   :  { %v1182_v48 = vmax.f32 %v1145_v31, 0.0  ;;  %v1305_v8 = vadd.f32 %v2341_v10, %v1304_v44  ;;  %v1362_v44 = vmax.f32 %v1287_v22, 0.0  ;;  %v1360_v31 = vmax.f32 %v1282_v39, 0.0 }
 0x28e   :  { %v1369_v36 = vmax.f32 %v1305_v8, 0.0 }
 0x28f   :  { %v1062_v26 = vpop.f32.mrf.mxu0 }
 0x290   :  { %v1063_v59 = vadd.f32 %v2261_v50, %v1062_v26 }
 0x291   :  { %v1146_v9 = vpop.f32.mrf.mxu1 }
 0x292   :  { %v1147_v37 = vadd.f32 %v1146_v9, %v1058_v13 }
 0x293   :  { %v1306_v41 = vpop.f32.mrf.mxu2 }
 0x294   :  { %v1183_v34 = vmax.f32 %v1147_v37, 0.0  ;;  %v1307_v3 = vadd.f32 %v2341_v10, %v1306_v41 }
 0x296   :  { %v1200_v49 = vpack.c.bf16 %v1183_v34, %v1182_v48  ;;  %v1370_v30 = vmax.f32 %v1307_v3, 0.0 }
 0x298   :  { %1348 = vmatmul.bf16.gmra.mxu2 %v1200_v49 }
 0x299   :  { %v1149_v42 = vpop.f32.mrf.mxu1 }
 0x29a   :  { %v1150_v40 = vadd.f32 %v1149_v42, %v1061_v56 }
 0x29b   :  { %v1309_v0 = vpop.f32.mrf.mxu2 }
 0x29c   :  { %v1184_v27 = vmax.f32 %v1150_v40, 0.0  ;;  %v1310_v35 = vadd.f32 %v2341_v10, %v1309_v0 }
 0x29e   :  { %v1371_v12 = vmax.f32 %v1310_v35, 0.0  ;;  %v1392_v35 = vld [vmem:[#allocation2] sm:$0x1] }
 0x2a1   :  { %v1151_v63 = vpop.f32.mrf.mxu1 }
 0x2a2   :  { %v1152_v57 = vadd.f32 %v1151_v63, %v1063_v59 }
 0x2a3   :  { %v1311_v58 = vpop.f32.mrf.mxu2 }
 0x2a4   :  { %v1185_v51 = vmax.f32 %v1152_v57, 0.0  ;;  %v1312_v25 = vadd.f32 %v2341_v10, %v1311_v58 }
 0x2a6   :  { %v1201_v15 = vpack.c.bf16 %v1185_v51, %v1184_v27  ;;  %v1372_v62 = vmax.f32 %v1312_v25, 0.0 }
 0x2a8   :  { %1353 = vmatmul.bf16.gmra.mxu2 %v1201_v15 }
 0x2ab   :  { %v1314_v52 = vpop.f32.mrf.mxu2 }
 0x2ac   :  { %v1315_v53 = vadd.f32 %v2341_v10, %v1314_v52 }
 0x2ae   :  { %v1373_v23 = vmax.f32 %v1315_v53, 0.0 }
 0x2b3   :  { %v1316_v33 = vpop.f32.mrf.mxu2 }
 0x2b4   :  { %v1317_v32 = vadd.f32 %v2341_v10, %v1316_v33 }
 0x2b6   :  { %v1374_v50 = vmax.f32 %v1317_v32, 0.0  ;;  %v1391_v32 = vld [vmem:[%s2412_s7] sm:$0x1]  ;;  %s1927_s7 = smov [#allocation11]  }
 0x2b7   :  { %s1455_s16 = sshll.u32 %s1927_s7, 4  ;;  %s1456_s16 = int_to_ptr.vmem [resolvable:$true] %s1455_s16 }
 0x2b8   :  { %1399 = vmatpush.xpose.msra.mxu3 %v1374_v50 }
 0x2bb   :  { %v2346_v43 = vpop.f32.mrf.mxu2 }
 0x2bc   :  { %1400 = vmatpush.xpose.msra.mxu3 %v1373_v23  ;;  %v1320_v11 = vadd.f32 %v2341_v10, %v2346_v43 }
 0x2be   :  { %v1375_v17 = vmax.f32 %v1320_v11, 0.0 }
 0x2c0   :  { %1401 = vmatpush.xpose.msra.mxu3 %v1372_v62  ;;  %v1926_v62 = vmov 0  }
 0x2c1   :  { %1785 = vset.pattern.permute.xlu0 %v1926_v62 }
 0x2c2   :  { %1395 = vperm.xlu0 %1785, %v1392_v35  }
 0x2c3   :  { %v2350_v6 = vpop.f32.mrf.mxu2 }
 0x2c4   :  { %1402 = vmatpush.xpose.msra.mxu3 %v1371_v12  ;;  %v1322_v61 = vadd.f32 %v2341_v10, %v2350_v6 }
 0x2c8   :  { %1403 = vmatpush.xpose.msra.mxu3 %v1370_v30 }
 0x2cb   :  { %v2354_v55 = vpop.f32.mrf.mxu2 }
 0x2cc   :  { %1404 = vmatpush.xpose.msra.mxu3 %v1369_v36  ;;  %v1325_v18 = vadd.f32 %v2341_v10, %v2354_v55 }
 0x2d0   :  { %1405 = vmatpush.xpose.msra.mxu3 %v1368_v5 }
 0x2d3   :  { %v2360_v28 = vpop.f32.mrf.mxu2 }
 0x2d4   :  { %1406 = vmatpush.xpose.msra.mxu3 %v1367_v24  ;;  %v1327_v54 = vadd.f32 %v2341_v10, %v2360_v28  ;;  %v1377_v24 = vmax.f32 %v1325_v18, 0.0 }
 0x2d6   :  { %v1378_v5 = vmax.f32 %v1327_v54, 0.0 }
 0x2d8   :  { %1407 = vmatpush.xpose.msra.mxu3 %v1366_v4  ;;  %v1376_v4 = vmax.f32 %v1322_v61, 0.0 }
 0x2db   :  { %v2366_v20 = vpop.f32.mrf.mxu2 }
 0x2dc   :  { %1408 = vmatpush.xpose.msra.mxu3 %v1365_v60  ;;  %v1330_v8 = vadd.f32 %v2341_v10, %v2366_v20 }
 0x2de   :  { %v1379_v36 = vmax.f32 %v1330_v8, 0.0 }
 0x2e0   :  { %1409 = vmatpush.xpose.msra.mxu3 %v1364_v19 }
 0x2e3   :  { %v1331_v47 = vpop.f32.mrf.mxu2 }
 0x2e4   :  { %1410 = vmatpush.xpose.msra.mxu3 %v1363_v7  ;;  %v1332_v3 = vadd.f32 %v2341_v10, %v1331_v47 }
 0x2e6   :  { %v1380_v30 = vmax.f32 %v1332_v3, 0.0 }
 0x2e8   :  { %1411 = vmatpush.xpose.msra.mxu3 %v1362_v44 }
 0x2eb   :  { %v1334_v13 = vpop.f32.mrf.mxu2 }
 0x2ec   :  { %1412 = vmatpush.xpose.msra.mxu3 %v1361_v14  ;;  %v1335_v25 = vadd.f32 %v2341_v10, %v1334_v13 }
 0x2ee   :  { %v1381_v12 = vmax.f32 %v1335_v25, 0.0 }
 0x2f0   :  { %1413 = vmatpush.xpose.msra.mxu3 %v1360_v31 }
 0x2f3   :  { %v1336_v9 = vpop.f32.mrf.mxu2 }
 0x2f4   :  { %1414 = vmatpush.xpose.msra.mxu3 %v1359_v46  ;;  %v1337_v53 = vadd.f32 %v2341_v10, %v1336_v9 }
 0x2f6   :  { %v1382_v23 = vmax.f32 %v1337_v53, 0.0 }
 0x2f7   :  { %1415 = vmatmul.f32.vlgmr.msra.gmra.mxu3 %v1391_v32 }
 0x2fb   :  { %v1339_v37 = vpop.f32.mrf.mxu2 }
 0x2fc   :  { %v1340_v52 = vadd.f32 %v2341_v10, %v1339_v37 }
 0x2fe   :  { %v1383_v50 = vmax.f32 %v1340_v52, 0.0 }
 0x303   :  { %v1341_v21 = vpop.f32.mrf.mxu2 }
 0x304   :  { %v1342_v51 = vadd.f32 %v2341_v10, %v1341_v21 }
 0x306   :  { %v1384_v33 = vmax.f32 %v1342_v51, 0.0 }
 0x30b   :  { %v1344_v41 = vpop.f32.mrf.mxu2 }
 0x30c   :  { %v1345_v58 = vadd.f32 %v2341_v10, %v1344_v41 }
 0x30e   :  { %v1385_v15 = vmax.f32 %v1345_v58, 0.0 }
 0x313   :  { %v1346_v1 = vpop.f32.mrf.mxu2 }
 0x314   :  { %v1347_v63 = vadd.f32 %v2341_v10, %v1346_v1 }
 0x316   :  { %v1386_v27 = vmax.f32 %v1347_v63, 0.0 }
 0x31b   :  { %v1349_v48 = vpop.f32.mrf.mxu2 }
 0x31c   :  { %v1350_v59 = vadd.f32 %v2341_v10, %v1349_v48 }
 0x31e   :  { %v1387_v57 = vmax.f32 %v1350_v59, 0.0 }
 0x323   :  { %v1351_v34 = vpop.f32.mrf.mxu2 }
 0x324   :  { %v1352_v2 = vadd.f32 %v2341_v10, %v1351_v34 }
 0x326   :  { %v1388_v40 = vmax.f32 %v1352_v2, 0.0 }
 0x32b   :  { %v1354_v49 = vpop.f32.mrf.mxu2 }
 0x32c   :  { %v1355_v0 = vadd.f32 %v2341_v10, %v1354_v49 }
 0x32e   :  { %v1389_v56 = vmax.f32 %v1355_v0, 0.0 }
 0x333   :  { %v1356_v42 = vpop.f32.mrf.mxu2 }
 0x334   :  { %v1357_v16 = vadd.f32 %v2341_v10, %v1356_v42  ;;  %v1396_v60 = vpop.permute.xlu0 %1395 }
 0x335   :  { %v1398_v20 = vperm.slane %v1396_v60, 0 }
 0x336   :  { %v1390_v26 = vmax.f32 %v1357_v16, 0.0 }
 0x338   :  { %1419 = vmatpush.xpose.msrb.mxu3 %v1390_v26 }
 0x33c   :  { %1420 = vmatpush.xpose.msrb.mxu3 %v1389_v56 }
 0x340   :  { %1421 = vmatpush.xpose.msrb.mxu3 %v1388_v40 }
 0x344   :  { %1422 = vmatpush.xpose.msrb.mxu3 %v1387_v57 }
 0x348   :  { %1423 = vmatpush.xpose.msrb.mxu3 %v1386_v27 }
 0x34c   :  { %1424 = vmatpush.xpose.msrb.mxu3 %v1385_v15 }
 0x350   :  { %1425 = vmatpush.xpose.msrb.mxu3 %v1384_v33 }
 0x354   :  { %1426 = vmatpush.xpose.msrb.mxu3 %v1383_v50 }
 0x358   :  { %1427 = vmatpush.xpose.msrb.mxu3 %v1382_v23 }
 0x35c   :  { %1428 = vmatpush.xpose.msrb.mxu3 %v1381_v12 }
 0x360   :  { %1429 = vmatpush.xpose.msrb.mxu3 %v1380_v30 }
 0x364   :  { %1430 = vmatpush.xpose.msrb.mxu3 %v1379_v36 }
 0x368   :  { %1431 = vmatpush.xpose.msrb.mxu3 %v1378_v5 }
 0x36c   :  { %1432 = vmatpush.xpose.msrb.mxu3 %v1377_v24 }
 0x370   :  { %1433 = vmatpush.xpose.msrb.mxu3 %v1376_v4 }
 0x374   :  { %1434 = vmatpush.xpose.msrb.mxu3 %v1375_v17 }
 0x377   :  { %1435 = vmatmul.f32.vlgmr.msrb.gmra.mxu3 %v1391_v32 }
 0x37a   :  { %v1416_v28 = vpop.f32.mrf.mxu3 }
 0x37b   :  { %v1417_v6 = vadd.f32 %v1416_v28, %v1398_v20 }
 0x3fa   :  { %v1436_v55 = vpop.f32.mrf.mxu3 }
 0x3fb   :  { %v1437_v19 = vadd.f32 %v1436_v55, %v1398_v20 }
 0x3fd   :  { %v1441_v10 = vrot.slane %v1437_v19, 7 }
 0x3ff   :  { %v1443_v43 = vsel %vm1442_vm0, %v1417_v6, %v1441_v10 }
 0x400   :  { %1449 = vst.msk [vmem:[#allocation11] sm:$0x3] %vm1447_vm1, %v1443_v43 }
 0x401   :  { %1460 = dma.vmem_to_hbm [thread:$0]  %s1456_s16, 32, %s1458_s19, [#allocation5]  }
 0x402   :  { %1914 = dma.done.wait [#allocation5], 32  }
 0x403   :  { %1915 = vsyncadd [#allocation5], 4294967264 }
 0x404   :  { %1465 = vsyncpa [#allocation4], 1 }
 0x405   :  { %1466 = vsyncpa [#allocation7], 1 }
 0x406   :  { %1467 = vsyncpa [#allocation10], 1 }
 0x407   :  { %1468 = vsyncpa [#allocation5], 1 }

</bundles_post_ra>
